<compile_context>
chip_gen: v7x
topology: tpu7x:2x2x1
jax: 0.10.0
libtpu: 0.0.40
codegen_flags: <defaults>
</compile_context>

<pallas_src>
import functools

import jax
import jax.numpy as jnp
from jax.experimental import pallas as pl
from jax.experimental.pallas import tpu as pltpu

# Logical sizes from the PyTorch module.
D_IN = 28 * 28          # 784
H1 = 300
H2 = 100

# Lane-padded sizes (multiples of 128 -> unmasked stores, MXU-friendly tiles).
D_IN_P = 896            # 784 -> 7 * 128
H1_P = 384              # 300 -> 3 * 128
H2_P = 128              # 100 -> 128


def _round_up(n, m):
    return ((n + m - 1) // m) * m


def _pad2d(a, rows, cols):
    return jnp.pad(a, ((0, rows - a.shape[0]), (0, cols - a.shape[1])))


def _vae_kernel(
    x_ref, eps_ref,
    ew1_ref, eb1_ref, ew2_ref, eb2_ref, ewad_ref, ebad_ref,
    dw1_ref, db1_ref, dw2_ref, db2_ref, dw3_ref, db3_ref,
    xrec_ref, zal_ref,
    *, zp,
):
    """One batch tile of the full VAE forward.

    Weights are VMEM-resident across grid steps (constant index_map); matmuls run
    in bf16 on the MXU with f32 accumulation; element-wise math stays f32.
    """
    wdt = ew1_ref.dtype

    def linear(a_f32, w_ref, b_ref):
        return (
            jnp.dot(a_f32.astype(wdt), w_ref[...],
                    preferred_element_type=jnp.float32)
            + b_ref[...]
        )

    x = x_ref[...]

    # ---- Encoder ----
    h1 = jnp.maximum(linear(x, ew1_ref, eb1_ref), 0.0)
    h2 = jnp.maximum(linear(h1, ew2_ref, eb2_ref), 0.0)
    # Fused mean / log-variance heads: single (H2_P, 2*zp) matmul, then slice.
    al = linear(h2, ewad_ref, ebad_ref)
    ave = al[:, :zp]
    log_dev = al[:, zp:]

    # ---- Reparameterization: z = ave + exp(log_dev / 2) * eps ----
    z = ave + jnp.exp(log_dev * 0.5) * eps_ref[...]

    # ---- Decoder ----
    d1 = jnp.maximum(linear(z, dw1_ref, db1_ref), 0.0)
    d2 = jnp.maximum(linear(d1, dw2_ref, db2_ref), 0.0)
    d3 = linear(d2, dw3_ref, db3_ref)
    # sigmoid = 1 / (1 + exp(-x)): exp + approx reciprocal run on the EUP slot.
    x_rec = pl.reciprocal(1.0 + jnp.exp(-d3), approx=True)

    xrec_ref[...] = x_rec
    # Pack z | ave | log_dev into one lane-dense (tb, 3*zp) store.
    zal_ref[...] = jnp.concatenate([z, ave, log_dev], axis=-1)


def pack_params(params, z_dim, weight_dtype=jnp.bfloat16):
    """Pad weights to lane-aligned shapes, fuse mu/log-var heads, cast to bf16.

    Zero padding is exact: padded input columns are zero, padded hidden units get
    zero weight+bias (ReLU(0)=0) and zero outgoing weights, so results match the
    unpadded network on the real (unpadded) slices.
    """
    zp = _round_up(max(z_dim, 128), 128)
    p = {k: v.astype(jnp.float32) for k, v in params.items()}

    ewa = _pad2d(p["ewa"], H2_P, zp)
    ewd = _pad2d(p["ewd"], H2_P, zp)
    eba = _pad2d(p["eba"], 1, zp)
    ebd = _pad2d(p["ebd"], 1, zp)

    return {
        "zp": zp,
        # encoder
        "ew1": _pad2d(p["ew1"], D_IN_P, H1_P).astype(weight_dtype),
        "eb1": _pad2d(p["eb1"], 1, H1_P),
        "ew2": _pad2d(p["ew2"], H1_P, H2_P).astype(weight_dtype),
        "eb2": _pad2d(p["eb2"], 1, H2_P),
        "ewad": jnp.concatenate([ewa, ewd], axis=1).astype(weight_dtype),
        "ebad": jnp.concatenate([eba, ebd], axis=1),
        # decoder
        "dw1": _pad2d(p["dw1"], zp, H2_P).astype(weight_dtype),
        "db1": _pad2d(p["db1"], 1, H2_P),
        "dw2": _pad2d(p["dw2"], H2_P, H1_P).astype(weight_dtype),
        "db2": _pad2d(p["db2"], 1, H1_P),
        "dw3": _pad2d(p["dw3"], H1_P, D_IN_P).astype(weight_dtype),
        "db3": _pad2d(p["db3"], 1, D_IN_P),
    }


def vae_forward(x, eps, packed, *, z_dim, block_b=256):
    """x: [B, 784] f32, eps: [B, z_dim] f32, packed: output of pack_params."""
    B = x.shape[0]
    zp = packed["zp"]

    tb = _round_up(min(block_b, _round_up(B, 8)), 8)   # batch tile (sublane-aligned)
    b_pad = _round_up(B, tb)

    xp = _pad2d(x.astype(jnp.float32), b_pad, D_IN_P)
    epsp = _pad2d(eps.astype(jnp.float32), b_pad, zp)

    weights = (
        packed["ew1"], packed["eb1"], packed["ew2"], packed["eb2"],
        packed["ewad"], packed["ebad"],
        packed["dw1"], packed["db1"], packed["dw2"], packed["db2"],
        packed["dw3"], packed["db3"],
    )

    row = lambda i: (i, 0)      # batch-tiled arrays
    const = lambda i: (0, 0)    # weights: same block every step -> stay resident

    in_specs = [
        pl.BlockSpec((tb, D_IN_P), row),
        pl.BlockSpec((tb, zp), row),
    ] + [pl.BlockSpec(w.shape, const) for w in weights]

    out_specs = (
        pl.BlockSpec((tb, D_IN_P), row),
        pl.BlockSpec((tb, 3 * zp), row),
    )
    out_shape = (
        jax.ShapeDtypeStruct((b_pad, D_IN_P), jnp.float32),   # reconstructed x (padded)
        jax.ShapeDtypeStruct((b_pad, 3 * zp), jnp.float32),   # z | ave | log_dev (padded)
    )

    # VMEM footprint at block_b=256: ~1 MiB bf16 weights + double-buffered f32
    # x/xrec tiles (~0.9 MiB each) -> well under default scoped limits on all
    # generations. Raise vmem_limit_bytes here only if block_b is pushed >~1024.
    xrec_p, zal_p = pl.pallas_call(
        functools.partial(_vae_kernel, zp=zp),
        out_shape=out_shape,
        grid=(b_pad // tb,),
        in_specs=in_specs,
        out_specs=out_specs,
        compiler_params=pltpu.CompilerParams(
            dimension_semantics=("parallel",),   # shard batch tiles across TCs (v7x)
        ),
    )(xp, epsp, *weights)

    x_rec = xrec_p[:B, :D_IN]
    z = zal_p[:B, 0:z_dim]
    ave = zal_p[:B, zp:zp + z_dim]
    log_dev = zal_p[:B, 2 * zp:2 * zp + z_dim]
    return x_rec, z, ave, log_dev


def init_params(key, z_dim):
    """Deterministic init mimicking nn.Linear's uniform(-1/sqrt(fan_in), 1/sqrt(fan_in))."""
    dims = {
        # encoder
        "ew1": (D_IN, H1), "eb1": (1, H1),
        "ew2": (H1, H2), "eb2": (1, H2),
        "ewa": (H2, z_dim), "eba": (1, z_dim),
        "ewd": (H2, z_dim), "ebd": (1, z_dim),
        # decoder
        "dw1": (z_dim, H2), "db1": (1, H2),
        "dw2": (H2, H1), "db2": (1, H1),
        "dw3": (H1, D_IN), "db3": (1, D_IN),
    }
    fan_in = {
        "ew1": D_IN, "eb1": D_IN, "ew2": H1, "eb2": H1,
        "ewa": H2, "eba": H2, "ewd": H2, "ebd": H2,
        "dw1": z_dim, "db1": z_dim, "dw2": H2, "db2": H2,
        "dw3": H1, "db3": H1,
    }
    params = {}
    for name, shape in dims.items():
        key, sub = jax.random.split(key)
        bound = 1.0 / jnp.sqrt(jnp.float32(fan_in[name]))
        params[name] = jax.random.uniform(
            sub, shape, dtype=jnp.float32, minval=-bound, maxval=bound
        )
    return params


if __name__ == "__main__":
    B = 32
    Z_DIM = 16

    key = jax.random.PRNGKey(0)
    k_x, k_eps, k_params = jax.random.split(key, 3)

    x = jax.random.uniform(k_x, (B, D_IN), dtype=jnp.float32)  # MNIST-like pixels in [0,1)
    # eps corresponds to torch.randn_like(ave); generated host-side for determinism.
    eps = jax.random.normal(k_eps, (B, Z_DIM), dtype=jnp.float32)
    params = init_params(k_params, Z_DIM)
    packed = pack_params(params, Z_DIM, weight_dtype=jnp.bfloat16)

    # block_b=16 -> 2 batch tiles: exercises the (parallel) batch grid while the
    # weights stay VMEM-resident across steps. Production: block_b=256..1024.
    x_rec, z, ave, log_dev = vae_forward(x, eps, packed, z_dim=Z_DIM, block_b=16)
    jax.block_until_ready((x_rec, z, ave, log_dev))

    # Reference mirroring the kernel numerics (bf16 weights/activations into the
    # matmul, f32 accumulation + f32 elementwise); sigmoid uses the exact form, so
    # tolerance covers the in-kernel approx reciprocal (~1e-3 max).
    def ref_forward(x, eps, p, wdt=jnp.bfloat16):
        def lin(a, w, b):
            return jnp.dot(a.astype(wdt), w.astype(wdt),
                           preferred_element_type=jnp.float32) + b
        h = jnp.maximum(lin(x, p["ew1"], p["eb1"]), 0.0)
        h = jnp.maximum(lin(h, p["ew2"], p["eb2"]), 0.0)
        r_ave = lin(h, p["ewa"], p["eba"])
        r_log_dev = lin(h, p["ewd"], p["ebd"])
        r_z = r_ave + jnp.exp(r_log_dev / 2.0) * eps
        d = jnp.maximum(lin(r_z, p["dw1"], p["db1"]), 0.0)
        d = jnp.maximum(lin(d, p["dw2"], p["db2"]), 0.0)
        return jax.nn.sigmoid(lin(d, p["dw3"], p["db3"])), r_z, r_ave, r_log_dev

    r_x, r_z, r_ave, r_ld = ref_forward(x, eps, params)
    assert jnp.allclose(x_rec, r_x, atol=1e-2), float(jnp.max(jnp.abs(x_rec - r_x)))
    assert jnp.allclose(z, r_z, atol=1e-2), float(jnp.max(jnp.abs(z - r_z)))
    assert jnp.allclose(ave, r_ave, atol=1e-2), float(jnp.max(jnp.abs(ave - r_ave)))
    assert jnp.allclose(log_dev, r_ld, atol=1e-2), float(jnp.max(jnp.abs(log_dev - r_ld)))

    print("KERNEL_OK")
</pallas_src>

<mosaic_0001>
module attributes {stable_mosaic.version = 11 : i64} {
  func.func @_vae_kernel(%arg0: i32, %arg1: memref<16x896xf32, #tpu.memory_space<vmem>>, %arg2: memref<16x128xf32, #tpu.memory_space<vmem>>, %arg3: memref<896x384xbf16, #tpu.memory_space<vmem>>, %arg4: memref<1x384xf32, #tpu.memory_space<vmem>>, %arg5: memref<384x128xbf16, #tpu.memory_space<vmem>>, %arg6: memref<1x128xf32, #tpu.memory_space<vmem>>, %arg7: memref<128x256xbf16, #tpu.memory_space<vmem>>, %arg8: memref<1x256xf32, #tpu.memory_space<vmem>>, %arg9: memref<128x128xbf16, #tpu.memory_space<vmem>>, %arg10: memref<1x128xf32, #tpu.memory_space<vmem>>, %arg11: memref<128x384xbf16, #tpu.memory_space<vmem>>, %arg12: memref<1x384xf32, #tpu.memory_space<vmem>>, %arg13: memref<384x896xbf16, #tpu.memory_space<vmem>>, %arg14: memref<1x896xf32, #tpu.memory_space<vmem>>, %arg15: memref<16x896xf32, #tpu.memory_space<vmem>>, %arg16: memref<16x384xf32, #tpu.memory_space<vmem>>) attributes {dimension_semantics = [#tpu.dimension_semantics<parallel>], iteration_bounds = array<i64: 2>, scalar_prefetch = 0 : i64, scratch_operands = 0 : i64, tpu.core_type = #tpu.core_type<tc>, window_params = [{transform_indices = @transform_0, window_bounds = array<i64: 16, 896>}, {transform_indices = @transform_1, window_bounds = array<i64: 16, 128>}, {pipeline_mode = #tpu.pipeline_mode<synchronous>, transform_indices = @transform_2, window_bounds = array<i64: 896, 384>}, {pipeline_mode = #tpu.pipeline_mode<synchronous>, transform_indices = @transform_3, window_bounds = array<i64: 1, 384>}, {pipeline_mode = #tpu.pipeline_mode<synchronous>, transform_indices = @transform_4, window_bounds = array<i64: 384, 128>}, {pipeline_mode = #tpu.pipeline_mode<synchronous>, transform_indices = @transform_5, window_bounds = array<i64: 1, 128>}, {pipeline_mode = #tpu.pipeline_mode<synchronous>, transform_indices = @transform_6, window_bounds = array<i64: 128, 256>}, {pipeline_mode = #tpu.pipeline_mode<synchronous>, transform_indices = @transform_7, window_bounds = array<i64: 1, 256>}, {pipeline_mode = #tpu.pipeline_mode<synchronous>, transform_indices = @transform_8, window_bounds = array<i64: 128, 128>}, {pipeline_mode = #tpu.pipeline_mode<synchronous>, transform_indices = @transform_9, window_bounds = array<i64: 1, 128>}, {pipeline_mode = #tpu.pipeline_mode<synchronous>, transform_indices = @transform_10, window_bounds = array<i64: 128, 384>}, {pipeline_mode = #tpu.pipeline_mode<synchronous>, transform_indices = @transform_11, window_bounds = array<i64: 1, 384>}, {pipeline_mode = #tpu.pipeline_mode<synchronous>, transform_indices = @transform_12, window_bounds = array<i64: 384, 896>}, {pipeline_mode = #tpu.pipeline_mode<synchronous>, transform_indices = @transform_13, window_bounds = array<i64: 1, 896>}, {transform_indices = @transform_14, window_bounds = array<i64: 16, 896>}, {transform_indices = @transform_15, window_bounds = array<i64: 16, 384>}]} {
    %c0 = arith.constant 0 : index
    %c0_0 = arith.constant 0 : index
    %0 = vector.load %arg1[%c0, %c0_0] : memref<16x896xf32, #tpu.memory_space<vmem>>, vector<16x896xf32>
    %1 = arith.truncf %0 : vector<16x896xf32> to vector<16x896xbf16>
    %c0_1 = arith.constant 0 : index
    %c0_2 = arith.constant 0 : index
    %2 = vector.load %arg3[%c0_1, %c0_2] : memref<896x384xbf16, #tpu.memory_space<vmem>>, vector<896x384xbf16>
    %cst = arith.constant dense<0.000000e+00> : vector<16x384xf32>
    %3 = tpu.matmul %1, %2, %cst {dimension_numbers = #tpu.dot_dimension_numbers<[1], [0], [0], [1], [0, 0, 1, 1], [], []>} : vector<16x896xbf16>, vector<896x384xbf16>, vector<16x384xf32> -> vector<16x384xf32>
    %c0_3 = arith.constant 0 : index
    %c0_4 = arith.constant 0 : index
    %4 = vector.load %arg4[%c0_3, %c0_4] : memref<1x384xf32, #tpu.memory_space<vmem>>, vector<1x384xf32>
    %5 = vector.broadcast %4 : vector<1x384xf32> to vector<16x384xf32>
    %6 = arith.addf %3, %5 : vector<16x384xf32>
    %cst_5 = arith.constant 0.000000e+00 : f32
    %7 = vector.broadcast %cst_5 : f32 to vector<16x384xf32>
    %8 = arith.maximumf %6, %7 : vector<16x384xf32>
    %9 = arith.truncf %8 : vector<16x384xf32> to vector<16x384xbf16>
    %c0_6 = arith.constant 0 : index
    %c0_7 = arith.constant 0 : index
    %10 = vector.load %arg5[%c0_6, %c0_7] : memref<384x128xbf16, #tpu.memory_space<vmem>>, vector<384x128xbf16>
    %cst_8 = arith.constant dense<0.000000e+00> : vector<16x128xf32>
    %11 = tpu.matmul %9, %10, %cst_8 {dimension_numbers = #tpu.dot_dimension_numbers<[1], [0], [0], [1], [0, 0, 1, 1], [], []>} : vector<16x384xbf16>, vector<384x128xbf16>, vector<16x128xf32> -> vector<16x128xf32>
    %c0_9 = arith.constant 0 : index
    %c0_10 = arith.constant 0 : index
    %12 = vector.load %arg6[%c0_9, %c0_10] : memref<1x128xf32, #tpu.memory_space<vmem>>, vector<1x128xf32>
    %13 = vector.broadcast %12 : vector<1x128xf32> to vector<16x128xf32>
    %14 = arith.addf %11, %13 : vector<16x128xf32>
    %cst_11 = arith.constant 0.000000e+00 : f32
    %15 = vector.broadcast %cst_11 : f32 to vector<16x128xf32>
    %16 = arith.maximumf %14, %15 : vector<16x128xf32>
    %17 = arith.truncf %16 : vector<16x128xf32> to vector<16x128xbf16>
    %c0_12 = arith.constant 0 : index
    %c0_13 = arith.constant 0 : index
    %18 = vector.load %arg7[%c0_12, %c0_13] : memref<128x256xbf16, #tpu.memory_space<vmem>>, vector<128x256xbf16>
    %cst_14 = arith.constant dense<0.000000e+00> : vector<16x256xf32>
    %19 = tpu.matmul %17, %18, %cst_14 {dimension_numbers = #tpu.dot_dimension_numbers<[1], [0], [0], [1], [0, 0, 1, 1], [], []>} : vector<16x128xbf16>, vector<128x256xbf16>, vector<16x256xf32> -> vector<16x256xf32>
    %c0_15 = arith.constant 0 : index
    %c0_16 = arith.constant 0 : index
    %20 = vector.load %arg8[%c0_15, %c0_16] : memref<1x256xf32, #tpu.memory_space<vmem>>, vector<1x256xf32>
    %21 = vector.broadcast %20 : vector<1x256xf32> to vector<16x256xf32>
    %22 = arith.addf %19, %21 : vector<16x256xf32>
    %23 = vector.extract_strided_slice %22 {offsets = [0, 0], sizes = [16, 128], strides = [1, 1]} : vector<16x256xf32> to vector<16x128xf32>
    %24 = vector.extract_strided_slice %22 {offsets = [0, 128], sizes = [16, 128], strides = [1, 1]} : vector<16x256xf32> to vector<16x128xf32>
    %cst_17 = arith.constant 5.000000e-01 : f32
    %25 = vector.broadcast %cst_17 : f32 to vector<16x128xf32>
    %26 = arith.mulf %24, %25 : vector<16x128xf32>
    %27 = math.exp %26 : vector<16x128xf32>
    %c0_18 = arith.constant 0 : index
    %c0_19 = arith.constant 0 : index
    %28 = vector.load %arg2[%c0_18, %c0_19] : memref<16x128xf32, #tpu.memory_space<vmem>>, vector<16x128xf32>
    %29 = arith.mulf %27, %28 : vector<16x128xf32>
    %30 = arith.addf %23, %29 : vector<16x128xf32>
    %31 = arith.truncf %30 : vector<16x128xf32> to vector<16x128xbf16>
    %c0_20 = arith.constant 0 : index
    %c0_21 = arith.constant 0 : index
    %32 = vector.load %arg9[%c0_20, %c0_21] : memref<128x128xbf16, #tpu.memory_space<vmem>>, vector<128x128xbf16>
    %cst_22 = arith.constant dense<0.000000e+00> : vector<16x128xf32>
    %33 = tpu.matmul %31, %32, %cst_22 {dimension_numbers = #tpu.dot_dimension_numbers<[1], [0], [0], [1], [0, 0, 1, 1], [], []>} : vector<16x128xbf16>, vector<128x128xbf16>, vector<16x128xf32> -> vector<16x128xf32>
    %c0_23 = arith.constant 0 : index
    %c0_24 = arith.constant 0 : index
    %34 = vector.load %arg10[%c0_23, %c0_24] : memref<1x128xf32, #tpu.memory_space<vmem>>, vector<1x128xf32>
    %35 = vector.broadcast %34 : vector<1x128xf32> to vector<16x128xf32>
    %36 = arith.addf %33, %35 : vector<16x128xf32>
    %cst_25 = arith.constant 0.000000e+00 : f32
    %37 = vector.broadcast %cst_25 : f32 to vector<16x128xf32>
    %38 = arith.maximumf %36, %37 : vector<16x128xf32>
    %39 = arith.truncf %38 : vector<16x128xf32> to vector<16x128xbf16>
    %c0_26 = arith.constant 0 : index
    %c0_27 = arith.constant 0 : index
    %40 = vector.load %arg11[%c0_26, %c0_27] : memref<128x384xbf16, #tpu.memory_space<vmem>>, vector<128x384xbf16>
    %cst_28 = arith.constant dense<0.000000e+00> : vector<16x384xf32>
    %41 = tpu.matmul %39, %40, %cst_28 {dimension_numbers = #tpu.dot_dimension_numbers<[1], [0], [0], [1], [0, 0, 1, 1], [], []>} : vector<16x128xbf16>, vector<128x384xbf16>, vector<16x384xf32> -> vector<16x384xf32>
    %c0_29 = arith.constant 0 : index
    %c0_30 = arith.constant 0 : index
    %42 = vector.load %arg12[%c0_29, %c0_30] : memref<1x384xf32, #tpu.memory_space<vmem>>, vector<1x384xf32>
    %43 = vector.broadcast %42 : vector<1x384xf32> to vector<16x384xf32>
    %44 = arith.addf %41, %43 : vector<16x384xf32>
    %cst_31 = arith.constant 0.000000e+00 : f32
    %45 = vector.broadcast %cst_31 : f32 to vector<16x384xf32>
    %46 = arith.maximumf %44, %45 : vector<16x384xf32>
    %47 = arith.truncf %46 : vector<16x384xf32> to vector<16x384xbf16>
    %c0_32 = arith.constant 0 : index
    %c0_33 = arith.constant 0 : index
    %48 = vector.load %arg13[%c0_32, %c0_33] : memref<384x896xbf16, #tpu.memory_space<vmem>>, vector<384x896xbf16>
    %cst_34 = arith.constant dense<0.000000e+00> : vector<16x896xf32>
    %49 = tpu.matmul %47, %48, %cst_34 {dimension_numbers = #tpu.dot_dimension_numbers<[1], [0], [0], [1], [0, 0, 1, 1], [], []>} : vector<16x384xbf16>, vector<384x896xbf16>, vector<16x896xf32> -> vector<16x896xf32>
    %c0_35 = arith.constant 0 : index
    %c0_36 = arith.constant 0 : index
    %50 = vector.load %arg14[%c0_35, %c0_36] : memref<1x896xf32, #tpu.memory_space<vmem>>, vector<1x896xf32>
    %51 = vector.broadcast %50 : vector<1x896xf32> to vector<16x896xf32>
    %52 = arith.addf %49, %51 : vector<16x896xf32>
    %cst_37 = arith.constant 0.000000e+00 : f32
    %53 = vector.broadcast %cst_37 : f32 to vector<16x896xf32>
    %54 = arith.subf %53, %52 : vector<16x896xf32>
    %55 = math.exp %54 : vector<16x896xf32>
    %cst_38 = arith.constant 1.000000e+00 : f32
    %56 = vector.broadcast %cst_38 : f32 to vector<16x896xf32>
    %57 = arith.addf %56, %55 : vector<16x896xf32>
    %58 = tpu.reciprocal %57 {approx = true} : vector<16x896xf32> -> vector<16x896xf32>
    %c0_39 = arith.constant 0 : index
    %c0_40 = arith.constant 0 : index
    %59 = vector.load %arg15[%c0_39, %c0_40] : memref<16x896xf32, #tpu.memory_space<vmem>>, vector<16x896xf32>
    tpu.vector_store %arg15[%c0_39, %c0_40], %58 {strides = array<i32>} : memref<16x896xf32, #tpu.memory_space<vmem>>, vector<16x896xf32>,
    %60 = tpu.concatenate %30, %23, %24 in 1 : vector<16x128xf32>, vector<16x128xf32>, vector<16x128xf32> -> vector<16x384xf32>
    %c0_41 = arith.constant 0 : index
    %c0_42 = arith.constant 0 : index
    %61 = vector.load %arg16[%c0_41, %c0_42] : memref<16x384xf32, #tpu.memory_space<vmem>>, vector<16x384xf32>
    tpu.vector_store %arg16[%c0_41, %c0_42], %60 {strides = array<i32>} : memref<16x384xf32, #tpu.memory_space<vmem>>, vector<16x384xf32>,
    return
  }
  func.func @transform_0(%arg0: i32) -> (i32, i32) {
    %c0_i32 = arith.constant 0 : i32
    %c0_i32_0 = arith.constant 0 : i32
    return %arg0, %c0_i32 : i32, i32
  }
  func.func @transform_1(%arg0: i32) -> (i32, i32) {
    %c0_i32 = arith.constant 0 : i32
    %c0_i32_0 = arith.constant 0 : i32
    return %arg0, %c0_i32 : i32, i32
  }
  func.func @transform_2(%arg0: i32) -> (i32, i32) {
    %c0_i32 = arith.constant 0 : i32
    %c0_i32_0 = arith.constant 0 : i32
    %c0_i32_1 = arith.constant 0 : i32
    return %c0_i32, %c0_i32_0 : i32, i32
  }
  func.func @transform_3(%arg0: i32) -> (i32, i32) {
    %c0_i32 = arith.constant 0 : i32
    %c0_i32_0 = arith.constant 0 : i32
    %c0_i32_1 = arith.constant 0 : i32
    return %c0_i32, %c0_i32_0 : i32, i32
  }
  func.func @transform_4(%arg0: i32) -> (i32, i32) {
    %c0_i32 = arith.constant 0 : i32
    %c0_i32_0 = arith.constant 0 : i32
    %c0_i32_1 = arith.constant 0 : i32
    return %c0_i32, %c0_i32_0 : i32, i32
  }
  func.func @transform_5(%arg0: i32) -> (i32, i32) {
    %c0_i32 = arith.constant 0 : i32
    %c0_i32_0 = arith.constant 0 : i32
    %c0_i32_1 = arith.constant 0 : i32
    return %c0_i32, %c0_i32_0 : i32, i32
  }
  func.func @transform_6(%arg0: i32) -> (i32, i32) {
    %c0_i32 = arith.constant 0 : i32
    %c0_i32_0 = arith.constant 0 : i32
    %c0_i32_1 = arith.constant 0 : i32
    return %c0_i32, %c0_i32_0 : i32, i32
  }
  func.func @transform_7(%arg0: i32) -> (i32, i32) {
    %c0_i32 = arith.constant 0 : i32
    %c0_i32_0 = arith.constant 0 : i32
    %c0_i32_1 = arith.constant 0 : i32
    return %c0_i32, %c0_i32_0 : i32, i32
  }
  func.func @transform_8(%arg0: i32) -> (i32, i32) {
    %c0_i32 = arith.constant 0 : i32
    %c0_i32_0 = arith.constant 0 : i32
    %c0_i32_1 = arith.constant 0 : i32
    return %c0_i32, %c0_i32_0 : i32, i32
  }
  func.func @transform_9(%arg0: i32) -> (i32, i32) {
    %c0_i32 = arith.constant 0 : i32
    %c0_i32_0 = arith.constant 0 : i32
    %c0_i32_1 = arith.constant 0 : i32
    return %c0_i32, %c0_i32_0 : i32, i32
  }
  func.func @transform_10(%arg0: i32) -> (i32, i32) {
    %c0_i32 = arith.constant 0 : i32
    %c0_i32_0 = arith.constant 0 : i32
    %c0_i32_1 = arith.constant 0 : i32
    return %c0_i32, %c0_i32_0 : i32, i32
  }
  func.func @transform_11(%arg0: i32) -> (i32, i32) {
    %c0_i32 = arith.constant 0 : i32
    %c0_i32_0 = arith.constant 0 : i32
    %c0_i32_1 = arith.constant 0 : i32
    return %c0_i32, %c0_i32_0 : i32, i32
  }
  func.func @transform_12(%arg0: i32) -> (i32, i32) {
    %c0_i32 = arith.constant 0 : i32
    %c0_i32_0 = arith.constant 0 : i32
    %c0_i32_1 = arith.constant 0 : i32
    return %c0_i32, %c0_i32_0 : i32, i32
  }
  func.func @transform_13(%arg0: i32) -> (i32, i32) {
    %c0_i32 = arith.constant 0 : i32
    %c0_i32_0 = arith.constant 0 : i32
    %c0_i32_1 = arith.constant 0 : i32
    return %c0_i32, %c0_i32_0 : i32, i32
  }
  func.func @transform_14(%arg0: i32) -> (i32, i32) {
    %c0_i32 = arith.constant 0 : i32
    %c0_i32_0 = arith.constant 0 : i32
    return %arg0, %c0_i32 : i32, i32
  }
  func.func @transform_15(%arg0: i32) -> (i32, i32) {
    %c0_i32 = arith.constant 0 : i32
    %c0_i32_0 = arith.constant 0 : i32
    return %arg0, %c0_i32 : i32, i32
  }
}

</mosaic_0001>

<bundles_post_ra>
// kernel: tpu_custom_call.1
= control target key start
LH: loop header
LB: loop body
LE: loop exit
PB: predicated region body
PF: predicated region fallthrough
CT: control target
= control target key end

     0   :  { %s7293_s0 = inlined_call_operand.hbm [shape: f32[32,896], index: 0, kind: input, shape index: {}]   ;;  %s7294_s1 = inlined_call_operand.hbm [shape: f32[32,128], index: 1, kind: input, shape index: {}]   ;;  %s7295_s2 = inlined_call_operand.hbm [shape: bf16[896,384], index: 2, kind: input, shape index: {}]   ;;  %s7296_s3 = inlined_call_operand.vmem [shape: f32[1,384], index: 3, kind: input, shape index: {}]   ;;  %s7297_s4 = inlined_call_operand.hbm [shape: bf16[384,128], index: 4, kind: input, shape index: {}]   ;;  %s7298_s5 = inlined_call_operand.vmem [shape: f32[1,128], index: 5, kind: input, shape index: {}]   ;;  %s7299_s6 = inlined_call_operand.hbm [shape: bf16[128,256], index: 6, kind: input, shape index: {}]   ;;  %s7300_s7 = inlined_call_operand.vmem [shape: f32[1,256], index: 7, kind: input, shape index: {}]   ;;  %s7301_s8 = inlined_call_operand.hbm [shape: bf16[128,128], index: 8, kind: input, shape index: {}]   ;;  %s7302_s9 = inlined_call_operand.vmem [shape: f32[1,128], index: 9, kind: input, shape index: {}]   ;;  %s7303_s10 = inlined_call_operand.hbm [shape: bf16[128,384], index: 10, kind: input, shape index: {}]   ;;  %s7304_s11 = inlined_call_operand.vmem [shape: f32[1,384], index: 11, kind: input, shape index: {}]   ;;  %s7305_s12 = inlined_call_operand.hbm [shape: bf16[384,896], index: 12, kind: input, shape index: {}]   ;;  %s7306_s13 = inlined_call_operand.vmem [shape: f32[1,896], index: 13, kind: input, shape index: {}]   ;;  %s7307_s14 = inlined_call_operand.hbm [shape: f32[32,896], index: 14, kind: output, shape index: {0}]   ;;  %s7308_s15 = inlined_call_operand.hbm [shape: f32[32,384], index: 15, kind: output, shape index: {1}]  }
   0x1   :  { %7318 = sst [smem:[#allocation27_spill]] %s7293_s0 }
   0x2   :  { %7319 = sst [smem:[#allocation28_spill]] %s7295_s2 }
   0x3   :  { %7320 = sst [smem:[#allocation29_spill]] %s7297_s4 }
   0x4   :  { %7321 = sst [smem:[#allocation30_spill]] %s7298_s5 }
   0x5   :  { %7322 = sst [smem:[#allocation31_spill]] %s7299_s6 }
   0x6   :  { %7323 = sst [smem:[#allocation32_spill]] %s7300_s7 }
   0x7   :  { %7324 = sst [smem:[#allocation33_spill]] %s7301_s8 }
   0x8   :  { %7325 = sst [smem:[#allocation34_spill]] %s7302_s9 }
   0x9   :  { %7326 = sst [smem:[#allocation35_spill]] %s7303_s10 }
   0xa   :  { %7327 = sst [smem:[#allocation36_spill]] %s7304_s11 }
   0xb   :  { %7328 = sst [smem:[#allocation37_spill]] %s7306_s13 }
   0xc   :  { %7329 = sst [smem:[#allocation38_spill]] %s7307_s14 }
   0xd   :  { %7330 = sst [smem:[#allocation39_spill]] %s7308_s15 }
   0xe   :  { %21 = vsyncpa [#allocation3], 0 }
   0xf   :  { %23 = vsyncpa [#allocation3 + $0x1], 0 }
  0x10   :  { %24 = vsyncpa [#allocation6], 0 }
  0x11   :  { %26 = vsyncpa [#allocation6 + $0x1], 0 }
  0x12   :  { %27 = vsyncpa [#allocation9], 0 }
  0x13   :  { %28 = vsyncpa [#allocation12], 0 }
  0x14   :  { %29 = vsyncpa [#allocation15], 0 }
  0x15   :  { %30 = vsyncpa [#allocation4], 0 }
  0x16   :  { %32 = vsyncpa [#allocation4 + $0x1], 0 }
  0x17   :  { %33 = vsyncpa [#allocation18], 0 }
  0x18   :  { %35 = vsyncpa [#allocation18 + $0x1], 0  ;;  %s6682_s18 = smov 0   ;;  %s6684_s19 = smov 0  }
  0x19   :  { %s6686_s20 = smov 0   ;;  %s6688_s21 = smov 0  }
  0x1a LB: > { %s6575_s22 = smov [#allocation7]   ;;  %s6703_s24 = sadd.s32 4294967295, %s6573_s21   ;;  %s6573_s21 = sphi %s6688_s21, %s7372_s21   ;;  %s6569_s20 = sphi %s6686_s20, %s7371_s20   ;;  %s6565_s19 = sphi %s6684_s19, %s7370_s19   ;;  %s6561_s18 = sphi %s6682_s18, %s7369_s18  }
  0x1b   : > { %s414_s23 = sshll.u32 %s6575_s22, 4  ;;  %p4739_p0 = scmp.ge.s32.totalorder %s6573_s21, 1  ;;  %s6708_s23 = int_to_ptr.vmem [resolvable:$true] %s414_s23 }
  0x1c   : > { %p7312_p1 = scmp.eq.s32.totalorder %s6703_s24, 0  ;;  %p402_p2 = scmp.lt.s32.totalorder %s6573_s21, 3 }
  0x1d   : > { %s6576_s26 = smov [#allocation8]   ;;  %s6577_s29 = smov [#allocation11]  }
  0x1e   : > { %p6710_p3 = pnand %p4739_p0, %p402_p2  ;;  %s430_s27 = sshll.u32 %s6576_s26, 4  ;;  %s6723_s27 = int_to_ptr.vmem [resolvable:$true] %s430_s27 }
  0x1f   : > { %s6725_s30 = sshll.u32 %s6577_s29, 4  ;;  %s7333_s2 = sld [smem:[#allocation28_spill]]  ;;  %s463_s30 = int_to_ptr.vmem [resolvable:$true] %s6725_s30 }
  0x20   : > { %s7331_s25 = scalar_select %p6710_p3, 1, 0 }
  0x21   : > { %p5513_p5 = pneg %p6710_p3 }
  0x23   : > { %p6719_p6 = pnand %p5513_p5, %p7312_p1 }
  0x25   : > { %s6227_s22 = scalar_lea.hbm %s7333_s2, 21504  ;;  %p6735_p8 = pneg %p6719_p6 }
  0x26   : > { %p6228_p7 = scmp.ne.s32.totalorder %s7333_s2, %s6227_s22  ;;  %p6234_p11 = scmp.lt.u32.totalorder %s6227_s22, %s7333_s2 }
  0x28   : > { %p6230_p9 = pnand %p6735_p8, %p6228_p7 }
  0x2a   : > { %p6231_p10 = pneg %p6230_p9 }
  0x2c   : > { %p6236_p12 = pnand %p6234_p11, %p6231_p10 }
  0x2e   : > { %6239 = shalt.err (!%p6236_p12)
}
  0x2f   : > { %s6240_s14 = scalar_lea.vmem %s6708_s23, 21504  ;;  %p6248_p5 = scmp.lt.s32.totalorder %s6708_s23, %s6708_s23 }
  0x30   : > { %p6241_p13 = scmp.ne.s32.totalorder %s6708_s23, %s6240_s14  ;;  %p6249_p4 = scmp.lt.s32.totalorder %s6240_s14, %s6240_s14 }
  0x32   : > { %p6243_p0 = pnand %p6241_p13, %p6735_p8  ;;  %p6250_p7 = por %p6249_p4, %p6248_p5 }
  0x34   : > { %p6244_p2 = pneg %p6243_p0 }
  0x36   : > { %p6251_p9 = pnand %p6250_p7, %p6244_p2 }
  0x38   : > { %6254 = shalt.err (!%p6251_p9)
}
  0x39   : > { %s7311_s15 = smov 192   ;;  %s7314_s13 = smov 12  }
  0x3a   : > { %5516 = dma.hbm_to_vmem [thread:$0]  (!%p6719_p6), %s7333_s2, 21504, %s6708_s23, [#allocation6], %s7311_s15, %s7311_s15, %s7314_s13  }
  0x3b   : > { %s7335_s4 = sld [smem:[#allocation29_spill]] }
  0x41   : > { %s6255_s14 = scalar_lea.hbm %s7335_s4, 3072 }
  0x42   : > { %p6256_p4 = scmp.ne.s32.totalorder %s7335_s4, %s6255_s14  ;;  %p6262_p12 = scmp.lt.u32.totalorder %s6255_s14, %s7335_s4 }
  0x44   : > { %p6258_p10 = pnand %p6256_p4, %p6735_p8 }
  0x46   : > { %p6259_p11 = pneg %p6258_p10 }
  0x48   : > { %p6264_p13 = pnand %p6262_p12, %p6259_p11 }
  0x4a   : > { %6267 = shalt.err (!%p6264_p13)
}
  0x4b   : > { %s6268_s23 = scalar_lea.vmem %s6723_s27, 3072  ;;  %p6276_p7 = scmp.lt.s32.totalorder %s6723_s27, %s6723_s27 }
  0x4c   : > { %p6269_p0 = scmp.ne.s32.totalorder %s6723_s27, %s6268_s23  ;;  %p6277_p9 = scmp.lt.s32.totalorder %s6268_s23, %s6268_s23 }
  0x4e   : > { %p6271_p2 = pnand %p6269_p0, %p6735_p8  ;;  %p6278_p4 = por %p6277_p9, %p6276_p7 }
  0x50   : > { %p6272_p5 = pneg %p6271_p2 }
  0x52   : > { %p6279_p10 = pnand %p6278_p4, %p6272_p5 }
  0x54   : > { %6282 = shalt.err (!%p6279_p10)
}
  0x55   : > { %s6580_s9 = smov 64   ;;  %s6581_s5 = smov 4  }
  0x56   : > { %5519 = dma.hbm_to_vmem [thread:$0]  (!%p6719_p6), %s7335_s4, 3072, %s6723_s27, [#allocation9], %s6580_s9, %s6580_s9, %s6581_s5  }
  0x57   : > { %s7336_s8 = sld [smem:[#allocation33_spill]] }
  0x5d   : > { %s6283_s22 = scalar_lea.hbm %s7336_s8, 1024 }
  0x5e   : > { %p6284_p11 = scmp.ne.s32.totalorder %s7336_s8, %s6283_s22  ;;  %p6290_p0 = scmp.lt.u32.totalorder %s6283_s22, %s7336_s8 }
  0x60   : > { %p6286_p12 = pnand %p6284_p11, %p6735_p8 }
  0x62   : > { %p6287_p13 = pneg %p6286_p12 }
  0x64   : > { %p6292_p2 = pnand %p6290_p0, %p6287_p13 }
  0x66   : > { %6295 = shalt.err (!%p6292_p2)
}
  0x67   : > { %s6296_s7 = scalar_lea.vmem %s463_s30, 1024  ;;  %p6304_p4 = scmp.lt.s32.totalorder %s463_s30, %s463_s30 }
  0x68   : > { %p6297_p5 = scmp.ne.s32.totalorder %s463_s30, %s6296_s7  ;;  %p6305_p10 = scmp.lt.s32.totalorder %s6296_s7, %s6296_s7 }
  0x6a   : > { %p6299_p7 = pnand %p6297_p5, %p6735_p8  ;;  %p6306_p1 = por %p6305_p10, %p6304_p4 }
  0x6c   : > { %p6300_p9 = pneg %p6299_p7 }
  0x6e   : > { %p6307_p3 = pnand %p6306_p1, %p6300_p9 }
  0x70   : > { %6310 = shalt.err (!%p6307_p3)
}
  0x71   : > { %5525 = dma.hbm_to_vmem [thread:$0]  (!%p6719_p6), %s7336_s8, 1024, %s463_s30, [#allocation12], %s6580_s9, %s6580_s9, %s6581_s5  }
  0x72   : > { %s6582_s15 = smov [#allocation10]   ;;  %s7337_s6 = sld [smem:[#allocation31_spill]] }
  0x73   : > { %s446_s16 = sshll.u32 %s6582_s15, 4  ;;  %s447_s16 = int_to_ptr.vmem [resolvable:$true] %s446_s16 }
  0x78   : > { %s6311_s29 = scalar_lea.hbm %s7337_s6, 2048 }
  0x79   : > { %p6312_p11 = scmp.ne.s32.totalorder %s7337_s6, %s6311_s29  ;;  %p6318_p12 = scmp.lt.u32.totalorder %s6311_s29, %s7337_s6 }
  0x7b   : > { %p6314_p1 = pnand %p6312_p11, %p6735_p8 }
  0x7d   : > { %p6315_p3 = pneg %p6314_p1 }
  0x7f   : > { %p6320_p13 = pnand %p6318_p12, %p6315_p3 }
  0x81   : > { %6323 = shalt.err (!%p6320_p13)
}
  0x82   : > { %s6324_s30 = scalar_lea.vmem %s447_s16, 2048  ;;  %p6332_p7 = scmp.lt.s32.totalorder %s447_s16, %s447_s16 }
  0x83   : > { %p6325_p0 = scmp.ne.s32.totalorder %s447_s16, %s6324_s30  ;;  %p6333_p9 = scmp.lt.s32.totalorder %s6324_s30, %s6324_s30 }
  0x85   : > { %p6327_p2 = pnand %p6325_p0, %p6735_p8  ;;  %p6334_p4 = por %p6333_p9, %p6332_p7 }
  0x87   : > { %p6328_p5 = pneg %p6327_p2 }
  0x89   : > { %p6335_p10 = pnand %p6334_p4, %p6328_p5 }
  0x8b   : > { %6338 = shalt.err (!%p6335_p10)
}
  0x8c   : > { %s7315_s9 = smov 128   ;;  %s7316_s5 = smov 8  }
  0x8d   : > { %5522 = dma.hbm_to_vmem [thread:$0]  (!%p6719_p6), %s7337_s6, 2048, %s447_s16, [#allocation9], %s7315_s9, %s7315_s9, %s7316_s5  }
  0x8e   : > { %s6585_s11 = smov [#allocation13]   ;;  %s6586_s17 = smov [#allocation14]  }
  0x8f   : > { %s478_s15 = sshll.u32 %s6585_s11, 4  ;;  %s494_s22 = sshll.u32 %s6586_s17, 4  ;;  %s479_s15 = int_to_ptr.vmem [resolvable:$true] %s478_s15  ;;  %s6822_s22 = int_to_ptr.vmem [resolvable:$true] %s494_s22 }
  0x90   : > { %s7338_s10 = sld [smem:[#allocation35_spill]] }
  0x96   : > { %s6339_s23 = scalar_lea.hbm %s7338_s10, 3072 }
  0x97   : > { %p6340_p11 = scmp.ne.s32.totalorder %s7338_s10, %s6339_s23  ;;  %p6346_p12 = scmp.lt.u32.totalorder %s6339_s23, %s7338_s10 }
  0x99   : > { %p6342_p1 = pnand %p6340_p11, %p6735_p8 }
  0x9b   : > { %p6343_p3 = pneg %p6342_p1 }
  0x9d   : > { %p6348_p13 = pnand %p6346_p12, %p6343_p3 }
  0x9f   : > { %6351 = shalt.err (!%p6348_p13)
}
  0xa0   : > { %s6352_s27 = scalar_lea.vmem %s479_s15, 3072  ;;  %p6360_p7 = scmp.lt.s32.totalorder %s479_s15, %s479_s15 }
  0xa1   : > { %p6353_p0 = scmp.ne.s32.totalorder %s479_s15, %s6352_s27  ;;  %p6361_p9 = scmp.lt.s32.totalorder %s6352_s27, %s6352_s27 }
  0xa3   : > { %p6355_p2 = pnand %p6353_p0, %p6735_p8  ;;  %p6362_p4 = por %p6361_p9, %p6360_p7 }
  0xa5   : > { %p6356_p5 = pneg %p6355_p2 }
  0xa7   : > { %p6363_p10 = pnand %p6362_p4, %p6356_p5 }
  0xa9   : > { %6366 = shalt.err (!%p6363_p10)
}
  0xaa   : > { %s7339_s11 = smov 12   ;;  %s7340_s17 = smov 192  }
  0xab   : > { %5528 = dma.hbm_to_vmem [thread:$0]  (!%p6719_p6), %s7338_s10, 3072, %s479_s15, [#allocation12], %s7340_s17, %s7340_s17, %s7339_s11  }
  0xac   : > { %s6367_s30 = scalar_lea.hbm %s7305_s12, 21504 }
  0xad   : > { %p6368_p11 = scmp.ne.s32.totalorder %s7305_s12, %s6367_s30  ;;  %p6374_p12 = scmp.lt.u32.totalorder %s6367_s30, %s7305_s12 }
  0xaf   : > { %p6370_p1 = pnand %p6368_p11, %p6735_p8 }
  0xb1   : > { %p6371_p3 = pneg %p6370_p1 }
  0xb3   : > { %p6376_p13 = pnand %p6374_p12, %p6371_p3 }
  0xb5   : > { %6379 = shalt.err (!%p6376_p13)
}
  0xb6   : > { %s6380_s15 = scalar_lea.vmem %s6822_s22, 21504  ;;  %p6388_p7 = scmp.lt.s32.totalorder %s6822_s22, %s6822_s22 }
  0xb7   : > { %p6381_p0 = scmp.ne.s32.totalorder %s6822_s22, %s6380_s15  ;;  %p6389_p9 = scmp.lt.s32.totalorder %s6380_s15, %s6380_s15 }
  0xb9   : > { %p6383_p2 = pnand %p6381_p0, %p6735_p8  ;;  %p6390_p4 = por %p6389_p9, %p6388_p7 }
  0xbb   : > { %p6384_p5 = pneg %p6383_p2 }
  0xbd   : > { %p6391_p10 = pnand %p6390_p4, %p6384_p5 }
  0xbf   : > { %6394 = shalt.err (!%p6391_p10)
}
  0xc0   : > { %s6587_s11 = smov 448   ;;  %s6588_s26 = smov 28  }
  0xc1   : > { %5531 = dma.hbm_to_vmem [thread:$0]  (!%p6719_p6), %s7305_s12, 21504, %s6822_s22, [#allocation15], %s6587_s11, %s6587_s11, %s6588_s26  }
  0xc2   : > { %s4738_s29 = sadd.s32 4294967294, %s6573_s21   ;;  %s6870_s14 = sadd.s32 1, %s6573_s21  }
  0xc3   : > { %s45_s23 = ssub.s32 %s6573_s21, %s6870_s14  ;;  %s48_s7 = sadd.s32 1, %s6569_s20 }
  0xc4   : > { %p46_p8 = scmp.eq.s32.totalorder %s45_s23, 0  ;;  %p55_p11 = scmp.ne.s32.totalorder %s6569_s20, %s6565_s19 }
  0xc5   : > { %p56_p1 = scmp.eq.s32.totalorder %s6573_s21, 0  ;;  %p61_p3 = scmp.ne.s32.totalorder %s6565_s19, %s6561_s18 }
  0xc6   : > { %s6881_s30 = scalar_select %p46_p8, %s6569_s20, %s48_s7  }
  0xc7   : > { %p57_p12 = por %p56_p1, %p55_p11  ;;  %p7341_p13 = scmp.eq.s32.totalorder %s6703_s24, 0 }
  0xc8   : > { %p363_p6 = scmp.eq.s32.totalorder %s6703_s24, 1  ;;  %p369_p2 = scmp.eq.s32.totalorder %s4738_s29, 1 }
  0xc9   : > { %p6885_p0 = por %p7341_p13, %p61_p3  ;;  %p5552_p5 = scmp.lt.s32.totalorder %s6573_s21, 2 }
  0xca   : > { %s6892_s22 = sand.u32 1, %s6569_s20   ;;  %p6894_p7 = por %p363_p6, %p55_p11 }
  0xcb   : > { %p6898_p9 = por %p369_p2, %p61_p3  ;;  %s5475_s27 = smul.u32 112, %s6892_s22 }
  0xcc   : > { %s7343_s13 = scalar_select %p6894_p7, 1, 0 }
  0xcd   : > { %s7344_s16 = scalar_select %p6898_p9, 1, 0 }
  0xce   : > { %s5476_s15 = smul.u32 1792, %s6573_s21  ;;  %p6904_p4 = pnand %p5552_p5, %p57_p12 }
  0xcf   : > { %s7346_s0 = sld [smem:[#allocation27_spill]]  ;;  %s515_s29 = scalar_lea.vmem [#allocation2], %s5475_s27 }
  0xd0   : > { %s523_s23 = sshll.u32 %s515_s29, 4  ;;  %s512_s5 = scalar_lea.sflag [#allocation3], %s6892_s22  ;;  %s6913_s23 = int_to_ptr.vmem [resolvable:$true] %s523_s23 }
  0xd1   : > { %p6397_p8 = pneg %p6904_p4 }
  0xd5   : > { %s6911_s17 = scalar_lea.hbm %s7346_s0, %s5476_s15  ;;  %s6400_s9 = scalar_lea.hbm %s7346_s0, 3584 }
  0xd6   : > { %s6395_s2 = scalar_lea.hbm %s6911_s17, 1792  ;;  %p6401_p3 = scmp.lt.u32.totalorder %s6911_s17, %s7346_s0 }
  0xd7   : > { %p6396_p10 = scmp.ne.s32.totalorder %s6911_s17, %s6395_s2  ;;  %p6402_p12 = scmp.lt.u32.totalorder %s6400_s9, %s6395_s2 }
  0xd8   : > { %p6404_p6 = scmp.lt.u32.totalorder %s6395_s2, %s6911_s17 }
  0xd9   : > { %p6398_p11 = pnand %p6397_p8, %p6396_p10  ;;  %p6403_p13 = por %p6402_p12, %p6401_p3 }
  0xdb   : > { %p6399_p1 = pneg %p6398_p11  ;;  %p6405_p2 = por %p6404_p6, %p6403_p13 }
  0xdd   : > { %p6406_p5 = pnand %p6405_p2, %p6399_p1 }
  0xdf   : > { %6409 = shalt.err (!%p6406_p5)
}
  0xe0   : > { %s6410_s27 = scalar_lea.vmem %s6913_s23, 1792  ;;  %s6589_s29 = smov [#allocation2]  }
  0xe1   : > { %p6411_p10 = scmp.ne.s32.totalorder %s6913_s23, %s6410_s27  ;;  %s6415_s15 = sshll.u32 %s6589_s29, 4  ;;  %s6416_s15 = int_to_ptr.vmem [resolvable:$false] %s6415_s15 }
  0xe2   : > { %s6417_s4 = scalar_lea.vmem %s6416_s15, 3584  ;;  %p6418_p7 = scmp.lt.s32.totalorder %s6913_s23, %s6416_s15 }
  0xe3   : > { %p6413_p11 = pnand %p6411_p10, %p6397_p8  ;;  %p6419_p3 = scmp.lt.s32.totalorder %s6417_s4, %s6410_s27 }
  0xe5   : > { %p6414_p9 = pneg %p6413_p11  ;;  %p6420_p12 = por %p6419_p3, %p6418_p7 }
  0xe7   : > { %p6421_p13 = pnand %p6420_p12, %p6414_p9 }
  0xe9   : > { %6424 = shalt.err (!%p6421_p13)
}
  0xea   : > { %s6590_s2 = smov 896   ;;  %s6591_s6 = smov 56  }
  0xeb   : > { %5535 = dma.hbm_to_vmem [thread:$0]  (!%p6904_p4), %s6911_s17, 1792, %s6913_s23, %s512_s5, %s6590_s2, %s6590_s2, %s6591_s6  }
  0xec   : > { %s4750_s26 = sshll.u32 %s6892_s22, 4  ;;  %s5179_s9 = sshll.u32 %s6573_s21, 8 }
  0xed   : > { %s6949_s15 = scalar_lea.hbm %s7294_s1, %s5179_s9  ;;  %s537_s4 = scalar_lea.vmem [#allocation5], %s4750_s26 }
  0xee   : > { %s544_s7 = sshll.u32 %s537_s4, 4  ;;  %s7347_s0 = sand.u32 1, %s6573_s21   ;;  %s6951_s7 = int_to_ptr.vmem [resolvable:$true] %s544_s7 }
  0xef   : > { %s6955_s8 = scalar_lea.sflag [#allocation6], %s7347_s0  ;;  %s6425_s10 = scalar_lea.hbm %s6949_s15, 256 }
  0xf0   : > { %p6426_p7 = scmp.ne.s32.totalorder %s6949_s15, %s6425_s10  ;;  %s6430_s17 = scalar_lea.hbm %s7294_s1, 512 }
  0xf1   : > { %p6431_p6 = scmp.lt.u32.totalorder %s6949_s15, %s7294_s1  ;;  %p6432_p2 = scmp.lt.u32.totalorder %s6430_s17, %s6425_s10 }
  0xf2   : > { %p6428_p9 = pnand %p6426_p7, %p6397_p8  ;;  %p6434_p10 = scmp.lt.u32.totalorder %s6425_s10, %s6949_s15 }
  0xf3   : > { %p6433_p5 = por %p6432_p2, %p6431_p6 }
  0xf4   : > { %p6429_p1 = pneg %p6428_p9 }
  0xf5   : > { %p6435_p11 = por %p6434_p10, %p6433_p5 }
  0xf7   : > { %p6436_p3 = pnand %p6435_p11, %p6429_p1 }
  0xf9   : > { %6439 = shalt.err (!%p6436_p3)
}
  0xfa   : > { %s6440_s0 = scalar_lea.vmem %s6951_s7, 256  ;;  %s6592_s6 = smov [#allocation5]  }
  0xfb   : > { %p6441_p12 = scmp.ne.s32.totalorder %s6951_s7, %s6440_s0  ;;  %s6445_s26 = sshll.u32 %s6592_s6, 4  ;;  %s6446_s26 = int_to_ptr.vmem [resolvable:$false] %s6445_s26 }
  0xfc   : > { %s6447_s9 = scalar_lea.vmem %s6446_s26, 512  ;;  %p6448_p9 = scmp.lt.s32.totalorder %s6951_s7, %s6446_s26 }
  0xfd   : > { %p6443_p13 = pnand %p6441_p12, %p6397_p8  ;;  %p6449_p6 = scmp.lt.s32.totalorder %s6447_s9, %s6440_s0 }
  0xff   : > { %p6444_p7 = pneg %p6443_p13  ;;  %p6450_p2 = por %p6449_p6, %p6448_p9 }
 0x101   : > { %p6451_p5 = pnand %p6450_p2, %p6444_p7 }
 0x103   : > { %6454 = shalt.err (!%p6451_p5)
}
 0x104   : > { %s7348_s10 = smov 8   ;;  %s7349_s29 = smov 128  }
 0x105   : > { %5538 = dma.hbm_to_vmem [thread:$0]  (!%p6904_p4), %s6949_s15, 256, %s6951_s7, %s6955_s8, %s7349_s29, %s7349_s29, %s7348_s10  }
 0x106   : > { %p7350_p8 = scmp.ne.s32.totalorder %s7331_s25, 0 }
 0x107   : > { %s6987_s27 = sand.u32 (!%p7350_p8), 1, %s6565_s19  }
 0x108   : > { %556 = sbr.rel (%p7350_p8) target bundleno = 2055 (0x807), region = 76  ;;  %s559_s5 = scalar_lea.sflag (!%p7350_p8), [#allocation3], %s6987_s27 }
 0x109   : > { %s5477_s4 = smul.u32 (!%p7350_p8), 112, %s6987_s27 }
 0x10b   : > { %s6993_s11 = scalar_lea.vmem (!%p7350_p8), [#allocation2], %s5477_s4 }
 0x10f   : > { %6528 = dma.done.wait (%p6885_p0), %s559_s5, 1792  }
 0x110   : > { %6530 = vsyncadd (%p6885_p0), %s559_s5, 4294965504  ;;  %s567_s8 = sand.u32 1, %s6703_s24   ;;  %s4754_s25 = sshll.u32 %s6987_s27, 4 }
 0x111   : > { %s568_s7 = scalar_lea.sflag [#allocation6], %s567_s8  ;;  %s7001_s15 = scalar_lea.vmem [#allocation5], %s4754_s25 }
 0x112   : > { %6532 = dma.done.wait (%p6885_p0), %s568_s7, 256  }
 0x113   : > { %6534 = vsyncadd (%p6885_p0), %s568_s7, 4294967040  ;;  %p7351_p4 = scmp.eq.s32.totalorder %s6703_s24, 0 }
 0x115   : > { %6536 = dma.done.wait (%p7351_p4), [#allocation6], 21504   ;;  %p7352_p1 = pmov %p7351_p4 }
 0x117   : > { %6538 = vsyncadd (%p7352_p1), [#allocation6], 4294945792  ;;  %p7353_p10 = pmov %p7352_p1 }
 0x118   : > { %p7354_p11 = pmov %p7352_p1 }
 0x119   : > { %6540 = dma.done.wait (%p7353_p10), [#allocation9], 5120  }
 0x11a   : > { %6542 = vsyncadd (%p7354_p11), [#allocation9], 4294962176  ;;  %p7355_p3 = pmov %p7352_p1 }
 0x11b   : > { %p7356_p12 = pmov %p7352_p1 }
 0x11c   : > { %6544 = dma.done.wait (%p7355_p3), [#allocation12], 4096  }
 0x11d   : > { %6546 = vsyncadd (%p7356_p12), [#allocation12], 4294963200  ;;  %p7357_p0 = pmov %p7352_p1 }
 0x11f   : > { %6548 = dma.done.wait (%p7357_p0), [#allocation15], 21504   ;;  %p7358_p13 = pmov %p7357_p0 }
 0x120   : > { %v5615_v0 = vld [vmem:[#allocation7 + $0x4] ss:$12 sps:$4 sm:$0xff]   ;;  %v5617_v1 = vld [vmem:[#allocation7] ss:$12 sps:$4 sm:$0xff]   ;;  %v5618_v2 = vld [vmem:[#allocation7 + $0x1c] ss:$12 sps:$4 sm:$0xff]  }
 0x121   : > { %6550 = vsyncadd (%p7358_p13), [#allocation15], 4294945792  ;;  %1815 = vmatprep.subr.bf16.mxu0 %v5615_v0  ;;  %v5620_v3 = vld [vmem:[#allocation7 + $0x18] ss:$12 sps:$4 sm:$0xff]   ;;  %v5621_v4 = vld [vmem:[#allocation7 + $0x34] ss:$12 sps:$4 sm:$0xff]  }
 0x122   : > { %1816 = vmatpush1.bf16.msra.mxu0 %v5617_v1  ;;  %v5623_v5 = vld [vmem:[#allocation7 + $0x30] ss:$12 sps:$4 sm:$0xff]   ;;  %v5624_v6 = vld [vmem:[#allocation7 + $0x4c] ss:$12 sps:$4 sm:$0xff]   ;;  %v5626_v7 = vld [vmem:[#allocation7 + $0x48] ss:$12 sps:$4 sm:$0xff]  }
 0x123   : > { %1817 = vmatprep.subr.bf16.mxu0 %v5618_v2  ;;  %v5627_v8 = vld [vmem:[#allocation7 + $0x64] ss:$12 sps:$4 sm:$0xff]   ;;  %v5629_v9 = vld [vmem:[#allocation7 + $0x60] ss:$12 sps:$4 sm:$0xff]   ;;  %v5630_v10 = vld [vmem:[#allocation7 + $0x7c] ss:$12 sps:$4 sm:$0xff]  }
 0x124   : > { %v5647_v11 = vld [vmem:[#allocation7 + $0xc8] ss:$12 sps:$4 sm:$0xff]   ;;  %v5632_v13 = vld [vmem:[#allocation7 + $0x78] ss:$12 sps:$4 sm:$0xff]   ;;  %v5652_v14 = vld [vmem:[#allocation7 + $0xe0] ss:$12 sps:$4 sm:$0xff]  }
 0x125   : > { %v5649_v12 = vld [vmem:[#allocation7 + $0x8] ss:$12 sps:$4 sm:$0xff]   ;;  %5180 = vmatprep.subr.bf16.mxu1 %v5647_v11  ;;  %v5654_v15 = vld [vmem:[#allocation7 + $0x20] ss:$12 sps:$4 sm:$0xff]   ;;  %v5657_v17 = vld [vmem:[#allocation7 + $0xf8] ss:$12 sps:$4 sm:$0xff]  }
 0x126   : > { %1818 = vmatpush1.bf16.msra.mxu0 %v5620_v3  ;;  %5181 = vmatpush3.bf16.msra.mxu1 %v5649_v12  ;;  %v5633_v16 = vld [vmem:[#allocation7 + $0x94] ss:$12 sps:$4 sm:$0xff]   ;;  %v5635_v18 = vld [vmem:[#allocation7 + $0x90] ss:$12 sps:$4 sm:$0xff]   ;;  %v5659_v19 = vld [vmem:[#allocation7 + $0x38] ss:$12 sps:$4 sm:$0xff]  }
 0x127   : > { %1819 = vmatprep.subr.bf16.mxu0 %v5621_v4  ;;  %5182 = vmatprep.subr.bf16.mxu1 %v5652_v14  ;;  %v5636_v20 = vld [vmem:[#allocation7 + $0xac] ss:$12 sps:$4 sm:$0xff]   ;;  %v5662_v21 = vld [vmem:[#allocation7 + $0x110] ss:$12 sps:$4 sm:$0xff]   ;;  %v5638_v23 = vld [vmem:[#allocation7 + $0xa8] ss:$12 sps:$4 sm:$0xff]  }
 0x128   : > { %v5664_v22 = vld [vmem:[#allocation7 + $0x50] ss:$12 sps:$4 sm:$0xff]   ;;  %v5667_v25 = vld [vmem:[#allocation7 + $0x128] ss:$12 sps:$4 sm:$0xff]   ;;  %v5641_v26 = vld [vmem:[#allocation7 + $0xc0] ss:$12 sps:$4 sm:$0xff]  }
 0x129   : > { %v5639_v24 = vld [vmem:[#allocation7 + $0xc4] ss:$12 sps:$4 sm:$0xff]   ;;  %v5669_v27 = vld [vmem:[#allocation7 + $0x68] ss:$12 sps:$4 sm:$0xff]   ;;  %v5672_v28 = vld [vmem:[#allocation7 + $0x140] ss:$12 sps:$4 sm:$0xff]  }
 0x12a   : > { %1820 = vmatpush1.bf16.msra.mxu0 %v5623_v5  ;;  %5183 = vmatpush3.bf16.msra.mxu1 %v5654_v15  ;;  %v5642_v29 = vld [vmem:[#allocation7 + $0xdc] ss:$12 sps:$4 sm:$0xff]   ;;  %v665_v31 = vld [vmem:[%s6993_s11 + $0x40] sm:$0xff]  ;;  %v5650_v39 = vld [vmem:[#allocation7 + $0x10c] ss:$12 sps:$4 sm:$0xff]   ;;  %vm6594_vm0 = vmmov 0  }
 0x12b   : > { %1821 = vmatprep.subr.bf16.mxu0 %v5624_v6  ;;  %5184 = vmatprep.subr.bf16.mxu1 %v5657_v17  ;;  %v658_v30 = vld [vmem:[%s6993_s11 + $0x8] sm:$0xff]  ;;  %v5645_v35 = vld [vmem:[#allocation7 + $0xf4] ss:$12 sps:$4 sm:$0xff]   ;;  %v5655_v42 = vld [vmem:[#allocation7 + $0x124] ss:$12 sps:$4 sm:$0xff]   ;;  %s7359_s2 = sld [smem:[#allocation30_spill]] }
 0x12c   : > { %v5674_v32 = vld [vmem:[#allocation7 + $0x80] ss:$12 sps:$4 sm:$0xff]   ;;  %v672_v33 = vpack.c.bf16 %v665_v31, %v658_v30  ;;  %v5644_v34 = vld [vmem:[#allocation7 + $0xd8] ss:$12 sps:$4 sm:$0xff]   ;;  %v5648_v37 = vld [vmem:[#allocation7 + $0xf0] ss:$12 sps:$4 sm:$0xff]  }
 0x12d   : > { %v5678_v36 = vld [vmem:[#allocation7 + $0x158] ss:$12 sps:$4 sm:$0xff]   ;;  %v5683_v40 = vld [vmem:[#allocation7 + $0x170] ss:$12 sps:$4 sm:$0xff]   ;;  %v5653_v41 = vld [vmem:[#allocation7 + $0x108] ss:$12 sps:$4 sm:$0xff]  }
 0x12e   : > { %1822 = vmatpush1.bf16.msra.mxu0 %v5626_v7  ;;  %5185 = vmatpush3.bf16.msra.mxu1 %v5659_v19  ;;  %v5679_v38 = vld [vmem:[#allocation7 + $0x98] ss:$12 sps:$4 sm:$0xff]   ;;  %v5684_v44 = vld [vmem:[#allocation7 + $0xb0] ss:$12 sps:$4 sm:$0xff]   ;;  %v5688_v45 = vld [vmem:[#allocation7 + $0x248] ss:$12 sps:$4 sm:$0xff]  }
 0x12f   : > { %1823 = vmatprep.subr.bf16.mxu0 %v5627_v8  ;;  %5186 = vmatprep.subr.bf16.mxu1 %v5662_v21  ;;  %v657_v43 = vld [vmem:[%s6993_s11] sm:$0xff]  ;;  %v664_v46 = vld [vmem:[%s6993_s11 + $0x38] sm:$0xff]  ;;  %v659_v17 = vld [vmem:[%s6993_s11 + $0x10] sm:$0xff]  ;;  %s7360_s26 = sld [smem:[#allocation32_spill]]  ;;  %s5478_s9 = smul.u32 48, %s6987_s27 }
 0x130   : > { %1847 = vmatprep.mubr.bf16.mxu0 %v672_v33  ;;  %2019 = vmatprep.mubr.bf16.mxu1 %v672_v33  ;;  %v5658_v47 = vld [vmem:[#allocation7 + $0x120] ss:$12 sps:$4 sm:$0xff]   ;;  %v5689_v48 = vld [vmem:[#allocation7 + $0x188] ss:$12 sps:$4 sm:$0xff]   ;;  %v671_v49 = vpack.c.bf16 %v664_v46, %v657_v43  ;;  %v5663_v52 = vld [vmem:[#allocation7 + $0x138] ss:$12 sps:$4 sm:$0xff]  }
 0x131   : > { %v5693_v50 = vld [vmem:[#allocation7 + $0x260] ss:$12 sps:$4 sm:$0xff]   ;;  %v5660_v51 = vld [vmem:[#allocation7 + $0x13c] ss:$12 sps:$4 sm:$0xff]   ;;  %v5698_v54 = vld [vmem:[#allocation7 + $0x278] ss:$12 sps:$4 sm:$0xff]  }
 0x132   : > { %1824 = vmatpush1.bf16.msra.mxu0 %v5629_v9  ;;  %5187 = vmatpush3.bf16.msra.mxu1 %v5664_v22  ;;  %v5694_v53 = vld [vmem:[#allocation7 + $0x1a0] ss:$12 sps:$4 sm:$0xff]   ;;  %v5699_v56 = vld [vmem:[#allocation7 + $0x1b8] ss:$12 sps:$4 sm:$0xff]   ;;  %v5668_v57 = vld [vmem:[#allocation7 + $0x150] ss:$12 sps:$4 sm:$0xff]  }
 0x133   : > { %1825 = vmatprep.subr.bf16.mxu0 %v5630_v10  ;;  %5188 = vmatprep.subr.bf16.mxu1 %v5667_v25  ;;  %v5665_v55 = vld [vmem:[#allocation7 + $0x154] ss:$12 sps:$4 sm:$0xff]   ;;  %v5703_v58 = vld [vmem:[#allocation7 + $0x290] ss:$12 sps:$4 sm:$0xff]   ;;  %v5670_v59 = vld [vmem:[#allocation7 + $0x16c] ss:$12 sps:$4 sm:$0xff]  }
 0x134   : > { %v5673_v60 = vld [vmem:[#allocation7 + $0x168] ss:$12 sps:$4 sm:$0xff]   ;;  %v5704_v61 = vld [vmem:[#allocation7 + $0x1d0] ss:$12 sps:$4 sm:$0xff]   ;;  %v5675_v0 = vld [vmem:[#allocation7 + $0x180] ss:$12 sps:$4 sm:$0xff]  }
 0x135   : > { %v5708_v62 = vld [vmem:[#allocation7 + $0x2a8] ss:$12 sps:$4 sm:$0xff]   ;;  %v5677_v63 = vld [vmem:[#allocation7 + $0x184] ss:$12 sps:$4 sm:$0xff]   ;;  %v5713_v2 = vld [vmem:[#allocation7 + $0x2c0] ss:$12 sps:$4 sm:$0xff]  }
 0x136   : > { %1826 = vmatpush1.bf16.msra.mxu0 %v5632_v13  ;;  %5189 = vmatpush3.bf16.msra.mxu1 %v5669_v27  ;;  %v5709_v1 = vld [vmem:[#allocation7 + $0x1e8] ss:$12 sps:$4 sm:$0xff]   ;;  %v5680_v4 = vld [vmem:[#allocation7 + $0x198] ss:$12 sps:$4 sm:$0xff]   ;;  %v5714_v5 = vld [vmem:[#allocation7 + $0x200] ss:$12 sps:$4 sm:$0xff]  }
 0x137   : > { %1827 = vmatprep.subr.bf16.mxu0 %v5633_v16  ;;  %5190 = vmatprep.subr.bf16.mxu1 %v5672_v28  ;;  %v5682_v3 = vld [vmem:[#allocation7 + $0x19c] ss:$12 sps:$4 sm:$0xff]   ;;  %v5718_v6 = vld [vmem:[#allocation7 + $0x2d8] ss:$12 sps:$4 sm:$0xff]   ;;  %v5687_v7 = vld [vmem:[#allocation7 + $0x1b4] ss:$12 sps:$4 sm:$0xff]  }
 0x138   : > { %v660_v8 = vld [vmem:[%s6993_s11 + $0x18] sm:$0xff]  ;;  %v667_v9 = vld [vmem:[%s6993_s11 + $0x50] sm:$0xff]  ;;  %v669_v43 = vld [vmem:[%s6993_s11 + $0x60] sm:$0xff]  ;;  %s7113_s10 = scalar_lea.vmem [#allocation17], %s5478_s9  ;;  %s7362_s7 = sld [smem:[#allocation36_spill]] }
 0x139   : > { %v5719_v10 = vld [vmem:[#allocation7 + $0x218] ss:$12 sps:$4 sm:$0xff]   ;;  %v674_v11 = vpack.c.bf16 %v667_v9, %v660_v8  ;;  %v5685_v12 = vld [vmem:[#allocation7 + $0x1b0] ss:$12 sps:$4 sm:$0xff]   ;;  %v5690_v15 = vld [vmem:[#allocation7 + $0x1c8] ss:$12 sps:$4 sm:$0xff]  }
 0x13a   : > { %1828 = vmatpush1.bf16.msra.mxu0 %v5635_v18  ;;  %5191 = vmatpush3.bf16.msra.mxu1 %v5674_v32  ;;  %v5723_v13 = vld [vmem:[#allocation7 + $0x2f0] ss:$12 sps:$4 sm:$0xff]   ;;  %v5692_v14 = vld [vmem:[#allocation7 + $0x1cc] ss:$12 sps:$4 sm:$0xff]   ;;  %v5728_v19 = vld [vmem:[#allocation7 + $0x3c8] ss:$12 sps:$4 sm:$0xff]  }
 0x13b   : > { %1829 = vmatprep.subr.bf16.mxu0 %v5636_v20  ;;  %5192 = vmatprep.subr.bf16.mxu1 %v5678_v36  ;;  %v5724_v16 = vld [vmem:[#allocation7 + $0x230] ss:$12 sps:$4 sm:$0xff]   ;;  %v5695_v21 = vld [vmem:[#allocation7 + $0x1e0] ss:$12 sps:$4 sm:$0xff]   ;;  %v5700_v27 = vld [vmem:[#allocation7 + $0x1f8] ss:$12 sps:$4 sm:$0xff]  }
 0x13c   : > { %v666_v18 = vld [vmem:[%s6993_s11 + $0x48] sm:$0xff]  ;;  %v5697_v20 = vld [vmem:[#allocation7 + $0x1e4] ss:$12 sps:$4 sm:$0xff]   ;;  %s7363_s22 = sld [smem:[#allocation37_spill]]  ;;  %s4553_s17 = sshll.u32 %s7113_s10, 4  ;;  %s7186_s17 = int_to_ptr.vmem [resolvable:$true] %s4553_s17 }
 0x13d   : > { %v7031_v22 = vpack.c.bf16 %v666_v18, %v659_v17  ;;  %v5702_v25 = vld [vmem:[#allocation7 + $0x1fc] ss:$12 sps:$4 sm:$0xff]   ;;  %v5738_v28 = vld [vmem:[#allocation7 + $0x3f8] ss:$12 sps:$4 sm:$0xff]   ;;  %v5755_v9 = vld [vmem:[#allocation7 + $0x300] ss:$12 sps:$4 sm:$0xff]  }
 0x13e   : > { %1830 = vmatpush1.bf16.msra.mxu0 %v5638_v23  ;;  %5193 = vmatpush3.bf16.msra.mxu1 %v5679_v38  ;;  %v5729_v23 = vld [vmem:[#allocation7 + $0x308] ss:$12 sps:$4 sm:$0xff]   ;;  %v5705_v30 = vld [vmem:[#allocation7 + $0x210] ss:$12 sps:$4 sm:$0xff]   ;;  %v5739_v31 = vld [vmem:[#allocation7 + $0x338] ss:$12 sps:$4 sm:$0xff]  }
 0x13f   : > { %1831 = vmatprep.subr.bf16.mxu0 %v5639_v24  ;;  %5194 = vmatprep.subr.bf16.mxu1 %v5683_v40  ;;  %v5733_v24 = vld [vmem:[#allocation7 + $0x3e0] ss:$12 sps:$4 sm:$0xff]   ;;  %v5743_v32 = vld [vmem:[#allocation7 + $0x410] ss:$12 sps:$4 sm:$0xff]   ;;  %v5748_v36 = vld [vmem:[#allocation7 + $0x428] ss:$12 sps:$4 sm:$0xff]  }
 0x140   : > { %v5712_v33 = vld [vmem:[#allocation7 + $0x22c] ss:$12 sps:$4 sm:$0xff]   ;;  %v5784_v8 = vld [vmem:[#allocation7 + $0x4e8] ss:$12 sps:$4 sm:$0xff]   ;;  %v5796_v17 = vld [vmem:[#allocation7 + $0x530] ss:$12 sps:$4 sm:$0xff]  }
 0x141   : > { %v5715_v38 = vld [vmem:[#allocation7 + $0x240] ss:$12 sps:$4 sm:$0xff]   ;;  %s5480_s23 = smul.u32 768, %s6703_s24  ;;  %s7364_s6 = sld [smem:[#allocation39_spill]] }
 0x142   : > { %1832 = vmatpush1.bf16.msra.mxu0 %v5641_v26  ;;  %5195 = vmatpush3.bf16.msra.mxu1 %v5684_v44  ;;  %v5734_v26 = vld [vmem:[#allocation7 + $0x320] ss:$12 sps:$4 sm:$0xff]   ;;  %v5720_v44 = vld [vmem:[#allocation7 + $0x258] ss:$12 sps:$4 sm:$0xff]   ;;  %s4522_s9 = scalar_lea.sflag [#allocation18], %s6987_s27  ;;  %p7365_p9 = scmp.ne.s32.totalorder %s7343_s13, 0 }
 0x143   : > { %1833 = vmatprep.subr.bf16.mxu0 %v5642_v29  ;;  %5202 = vmatprep.subr.bf16.mxu1 %v5688_v45  ;;  %v5707_v29 = vld [vmem:[#allocation7 + $0x214] ss:$12 sps:$4 sm:$0xff]   ;;  %s6596_s29 = smov [#allocation17]  }
 0x144   : > { %v5753_v40 = vld [vmem:[#allocation7 + $0x440] ss:$12 sps:$4 sm:$0xff]   ;;  %s6459_s5 = sshll.u32 %s6596_s29, 4  ;;  %s6460_s5 = int_to_ptr.vmem [resolvable:$false] %s6459_s5 }
 0x145   : > { %2020 = vmatmul.mubr.bf16.vlgmr.msra.gmra.mrb[0].mxu1 %v671_v49  ;;  %v5754_v45 = vld [vmem:[#allocation7 + $0x380] ss:$12 sps:$4 sm:$0xff]   ;;  %p6462_p5 = scmp.lt.s32.totalorder %s7186_s17, %s6460_s5 }
 0x146   : > { %1834 = vmatpush1.bf16.msra.mxu0 %v5644_v34  ;;  %5203 = vmatpush3.bf16.msra.mxu1 %v5689_v48  ;;  %v5710_v34 = vld [vmem:[#allocation7 + $0x228] ss:$12 sps:$4 sm:$0xff]  }
 0x147   : > { %1835 = vmatprep.subr.bf16.mxu0 %v5645_v35  ;;  %5204 = vmatprep.subr.bf16.mxu1 %v5693_v50  ;;  %v5744_v35 = vld [vmem:[#allocation7 + $0x350] ss:$12 sps:$4 sm:$0xff]   ;;  %v5727_v48 = vld [vmem:[#allocation7 + $0x274] ss:$12 sps:$4 sm:$0xff]   ;;  %v5759_v50 = vld [vmem:[#allocation7 + $0x398] ss:$12 sps:$4 sm:$0xff]  }
 0x148   : > { %2060 = vmatprep.mubr.bf16.mxu1 %v674_v11  ;;  %v663_v18 = vld [vmem:[%s6993_s11 + $0x30] sm:$0xff] }
 0x14a   : > { %1836 = vmatpush1.bf16.msra.mxu0 %v5648_v37  ;;  %5205 = vmatpush3.bf16.msra.mxu1 %v5694_v53  ;;  %v5717_v37 = vld [vmem:[#allocation7 + $0x244] ss:$12 sps:$4 sm:$0xff]  }
 0x14b   : > { %1837 = vmatprep.subr.bf16.mxu0 %v5650_v39  ;;  %5206 = vmatprep.subr.bf16.mxu1 %v5698_v54  ;;  %v5749_v39 = vld [vmem:[#allocation7 + $0x368] ss:$12 sps:$4 sm:$0xff]   ;;  %v5764_v53 = vld [vmem:[#allocation7 + $0x3b0] ss:$12 sps:$4 sm:$0xff]  }
 0x14c   : > { %v661_v54 = vld [vmem:[%s6993_s11 + $0x20] sm:$0xff] }
 0x14e   : > { %1838 = vmatpush1.bf16.msra.mxu0 %v5653_v41  ;;  %5207 = vmatpush3.bf16.msra.mxu1 %v5699_v56  ;;  %v5722_v41 = vld [vmem:[#allocation7 + $0x25c] ss:$12 sps:$4 sm:$0xff]  }
 0x14f   : > { %1839 = vmatprep.subr.bf16.mxu0 %v5655_v42  ;;  %5208 = vmatprep.subr.bf16.mxu1 %v5703_v58  ;;  %v662_v42 = vld [vmem:[%s6993_s11 + $0x28] sm:$0xff] }
 0x150   : > { %v7036_v46 = vpack.c.bf16 %v669_v43, %v662_v42  ;;  %v5730_v56 = vld [vmem:[#allocation7 + $0x288] ss:$12 sps:$4 sm:$0xff]   ;;  %v5809_v43 = vld [vmem:[#allocation7 + $0x450] ss:$12 sps:$4 sm:$0xff]  }
 0x151   : > { %v5811_v42 = vld [vmem:[#allocation7 + $0x454] ss:$12 sps:$4 sm:$0xff]  }
 0x152   : > { %1840 = vmatpush1.bf16.msra.mxu0 %v5658_v47  ;;  %5209 = vmatpush3.bf16.msra.mxu1 %v5704_v61  ;;  %v5758_v47 = vld [vmem:[#allocation7 + $0x458] ss:$12 sps:$4 sm:$0xff]   ;;  %v6593_v61 = vmov 0.0  }
 0x153   : > { %1841 = vmatprep.subr.bf16.mxu0 %v5660_v51  ;;  %5210 = vmatprep.subr.bf16.mxu1 %v5708_v62  ;;  %v5763_v51 = vld [vmem:[#allocation7 + $0x470] ss:$12 sps:$4 sm:$0xff]  }
 0x154   : > { %v5742_v62 = vld [vmem:[#allocation7 + $0x2bc] ss:$12 sps:$4 sm:$0xff]  }
 0x156   : > { %1842 = vmatpush1.bf16.msra.mxu0 %v5663_v52  ;;  %5211 = vmatpush3.bf16.msra.mxu1 %v5709_v1  ;;  %v5732_v52 = vld [vmem:[#allocation7 + $0x28c] ss:$12 sps:$4 sm:$0xff]   ;;  %v5747_v1 = vld [vmem:[#allocation7 + $0x2d4] ss:$12 sps:$4 sm:$0xff]  }
 0x157   : > { %1843 = vmatprep.subr.bf16.mxu0 %v5665_v55  ;;  %5212 = vmatprep.subr.bf16.mxu1 %v5713_v2  ;;  %v668_v55 = vld [vmem:[%s6993_s11 + $0x58] sm:$0xff] }
 0x158   : > { %v7041_v58 = vpack.c.bf16 %v668_v55, %v661_v54  ;;  %v5776_v2 = vld [vmem:[#allocation7 + $0x4b8] ss:$12 sps:$4 sm:$0xff]   ;;  %v5824_v54 = vld [vmem:[#allocation7 + $0x4c8] ss:$12 sps:$4 sm:$0xff]  }
 0x159   : > { %v5829_v55 = vld [vmem:[#allocation7 + $0x4e4] ss:$12 sps:$4 sm:$0xff]  }
 0x15a   : > { %1844 = vmatpush1.bf16.msra.mxu0 %v5668_v57  ;;  %5213 = vmatpush3.bf16.msra.mxu1 %v5714_v5  ;;  %v5737_v57 = vld [vmem:[#allocation7 + $0x2a4] ss:$12 sps:$4 sm:$0xff]  }
 0x15b   : > { %1845 = vmatprep.subr.bf16.mxu0 %v5670_v59  ;;  %5214 = vmatprep.subr.bf16.mxu1 %v5718_v6  ;;  %v5768_v59 = vld [vmem:[#allocation7 + $0x488] ss:$12 sps:$4 sm:$0xff]   ;;  %v5780_v5 = vld [vmem:[#allocation7 + $0x4d0] ss:$12 sps:$4 sm:$0xff]  }
 0x15c   : > { %v5750_v6 = vld [vmem:[#allocation7 + $0x2e8] ss:$12 sps:$4 sm:$0xff]  }
 0x15e   : > { %1846 = vmatpush1.bf16.msra.mxu0 %v5673_v60  ;;  %5215 = vmatpush3.bf16.msra.mxu1 %v5719_v10  ;;  %v5735_v60 = vld [vmem:[#allocation7 + $0x2a0] ss:$12 sps:$4 sm:$0xff]   ;;  %v5762_v10 = vld [vmem:[#allocation7 + $0x31c] ss:$12 sps:$4 sm:$0xff]  }
 0x15f   : > { %1858 = vmatprep.subr.bf16.mxu0 %v5677_v63  ;;  %5216 = vmatprep.subr.bf16.mxu1 %v5723_v13  ;;  %v5772_v63 = vld [vmem:[#allocation7 + $0x4a0] ss:$12 sps:$4 sm:$0xff]  }
 0x160   : > { %v5767_v13 = vld [vmem:[#allocation7 + $0x334] ss:$12 sps:$4 sm:$0xff]  }
 0x161   : > { %1848 = vmatmul.mubr.bf16.vlgmr.msra.gmra.mrb[0].mxu0 %v671_v49  ;;  %v5725_v49 = vld [vmem:[#allocation7 + $0x270] ss:$12 sps:$4 sm:$0xff]  }
 0x162   : > { %1859 = vmatpush1.bf16.msra.mxu0 %v5675_v0  ;;  %1890 = vmatprep.mubr.bf16.mxu0 %v674_v11  ;;  %v5740_v0 = vld [vmem:[#allocation7 + $0x2b8] ss:$12 sps:$4 sm:$0xff]   ;;  %v5788_v11 = vld [vmem:[#allocation7 + $0x500] ss:$12 sps:$4 sm:$0xff]  }
 0x163   : > { %1860 = vmatprep.subr.bf16.mxu0 %v5682_v3  ;;  %5217 = vmatpush3.bf16.msra.mxu1 %v5724_v16  ;;  %v5745_v3 = vld [vmem:[#allocation7 + $0x2d0] ss:$12 sps:$4 sm:$0xff]   ;;  %v5771_v16 = vld [vmem:[#allocation7 + $0x34c] ss:$12 sps:$4 sm:$0xff]  }
 0x164   : > { %5224 = vmatprep.subr.bf16.mxu1 %v5728_v19  ;;  %v670_v19 = vld [vmem:[%s6993_s11 + $0x68] sm:$0xff]  ;;  %s7361_s11 = sld [smem:[#allocation34_spill]] }
 0x166   : > { %1861 = vmatpush1.bf16.msra.mxu0 %v5680_v4  ;;  %2061 = vmatmul.mubr.bf16.vlgmr.msra.gmra.mrb[4].mxu1 %v7031_v22  ;;  %v5752_v4 = vld [vmem:[#allocation7 + $0x2ec] ss:$12 sps:$4 sm:$0xff]  }
 0x167   : > { %1862 = vmatprep.subr.bf16.mxu0 %v5687_v7  ;;  %5225 = vmatpush3.bf16.msra.mxu1 %v5729_v23  ;;  %v5757_v7 = vld [vmem:[#allocation7 + $0x304] ss:$12 sps:$4 sm:$0xff]   ;;  %v7058_v23 = vpack.c.bf16 %v670_v19, %v663_v18  ;;  %v904_v18 = vlaneseq }
 0x168   : > { %5226 = vmatprep.subr.bf16.mxu1 %v5733_v24  ;;  %2101 = vmatprep.mubr.bf16.mxu1 %v7036_v46  ;;  %v5779_v24 = vld [vmem:[#allocation7 + $0x37c] ss:$12 sps:$4 sm:$0xff]  }
 0x169   : > { %v7067_v19 = vshrl.u32 %v904_v18, 7  ;;  %v5863_v18 = vld [vmem:[#allocation10] ss:$8 sps:$4 sm:$0xff]  }
 0x16a   : > { %1863 = vmatpush1.bf16.msra.mxu0 %v5685_v12  ;;  %v5760_v12 = vld [vmem:[#allocation7 + $0x318] ss:$12 sps:$4 sm:$0xff]  }
 0x16b   : > { %1864 = vmatprep.subr.bf16.mxu0 %v5692_v14  ;;  %5227 = vmatpush3.bf16.msra.mxu1 %v5734_v26  ;;  %v5792_v14 = vld [vmem:[#allocation7 + $0x518] ss:$12 sps:$4 sm:$0xff]   ;;  %v5783_v26 = vld [vmem:[#allocation7 + $0x394] ss:$12 sps:$4 sm:$0xff]  }
 0x16c   : > { %5228 = vmatprep.subr.bf16.mxu1 %v5738_v28  ;;  %v5787_v28 = vld [vmem:[#allocation7 + $0x3ac] ss:$12 sps:$4 sm:$0xff]  }
 0x16e   : > { %1865 = vmatpush1.bf16.msra.mxu0 %v5690_v15  ;;  %v5765_v15 = vld [vmem:[#allocation7 + $0x330] ss:$12 sps:$4 sm:$0xff]  }
 0x16f   : > { %1866 = vmatprep.subr.bf16.mxu0 %v5697_v20  ;;  %5229 = vmatpush3.bf16.msra.mxu1 %v5739_v31  ;;  %v5769_v20 = vld [vmem:[#allocation7 + $0x348] ss:$12 sps:$4 sm:$0xff]   ;;  %v5789_v31 = vld [vmem:[#allocation7 + $0x3c0] ss:$12 sps:$4 sm:$0xff]  }
 0x170   : > { %5230 = vmatprep.subr.bf16.mxu1 %v5743_v32  ;;  %v5795_v32 = vld [vmem:[#allocation7 + $0x3dc] ss:$12 sps:$4 sm:$0xff]  }
 0x172   : > { %1867 = vmatpush1.bf16.msra.mxu0 %v5695_v21  ;;  %v5775_v21 = vld [vmem:[#allocation7 + $0x364] ss:$12 sps:$4 sm:$0xff]  }
 0x173   : > { %1868 = vmatprep.subr.bf16.mxu0 %v5702_v25  ;;  %5231 = vmatpush3.bf16.msra.mxu1 %v5744_v35  ;;  %v5777_v25 = vld [vmem:[#allocation7 + $0x378] ss:$12 sps:$4 sm:$0xff]   ;;  %v5797_v35 = vld [vmem:[#allocation7 + $0x3f0] ss:$12 sps:$4 sm:$0xff]  }
 0x174   : > { %5232 = vmatprep.subr.bf16.mxu1 %v5748_v36  ;;  %v5802_v36 = vld [vmem:[#allocation7 + $0x40c] ss:$12 sps:$4 sm:$0xff]  }
 0x176   : > { %1869 = vmatpush1.bf16.msra.mxu0 %v5700_v27  ;;  %v5781_v27 = vld [vmem:[#allocation7 + $0x390] ss:$12 sps:$4 sm:$0xff]  }
 0x177   : > { %1870 = vmatprep.subr.bf16.mxu0 %v5707_v29  ;;  %5233 = vmatpush3.bf16.msra.mxu1 %v5749_v39  ;;  %v5785_v29 = vld [vmem:[#allocation7 + $0x3a8] ss:$12 sps:$4 sm:$0xff]   ;;  %v5803_v39 = vld [vmem:[#allocation7 + $0x420] ss:$12 sps:$4 sm:$0xff]  }
 0x178   : > { %5234 = vmatprep.subr.bf16.mxu1 %v5753_v40  ;;  %v5808_v40 = vld [vmem:[#allocation7 + $0x43c] ss:$12 sps:$4 sm:$0xff]  }
 0x17a   : > { %1871 = vmatpush1.bf16.msra.mxu0 %v5705_v30  ;;  %v5791_v30 = vld [vmem:[#allocation7 + $0x3c4] ss:$12 sps:$4 sm:$0xff]  }
 0x17b   : > { %1872 = vmatprep.subr.bf16.mxu0 %v5712_v33  ;;  %5235 = vmatpush3.bf16.msra.mxu1 %v5754_v45  ;;  %v5793_v33 = vld [vmem:[#allocation7 + $0x3d8] ss:$12 sps:$4 sm:$0xff]   ;;  %v5812_v45 = vld [vmem:[#allocation7 + $0x468] ss:$12 sps:$4 sm:$0xff]  }
 0x17c   : > { %5236 = vmatprep.subr.bf16.mxu1 %v5758_v47  ;;  %v5815_v47 = vld [vmem:[#allocation7 + $0x480] ss:$12 sps:$4 sm:$0xff]  }
 0x17e   : > { %1873 = vmatpush1.bf16.msra.mxu0 %v5710_v34  ;;  %v5799_v34 = vld [vmem:[#allocation7 + $0x3f4] ss:$12 sps:$4 sm:$0xff]  }
 0x17f   : > { %1874 = vmatprep.subr.bf16.mxu0 %v5717_v37  ;;  %5237 = vmatpush3.bf16.msra.mxu1 %v5759_v50  ;;  %v5800_v37 = vld [vmem:[#allocation7 + $0x408] ss:$12 sps:$4 sm:$0xff]  }
 0x180   : > { %5238 = vmatprep.subr.bf16.mxu1 %v5763_v51  ;;  %v5823_v50 = vld [vmem:[#allocation7 + $0x4b4] ss:$12 sps:$4 sm:$0xff]   ;;  %v6595_v51 = vmov 0  }
 0x182   : > { %1875 = vmatpush1.bf16.msra.mxu0 %v5715_v38  ;;  %v5805_v38 = vld [vmem:[#allocation7 + $0x424] ss:$12 sps:$4 sm:$0xff]  }
 0x183   : > { %1876 = vmatprep.subr.bf16.mxu0 %v5722_v41  ;;  %5239 = vmatpush3.bf16.msra.mxu1 %v5764_v53  ;;  %v5806_v41 = vld [vmem:[#allocation7 + $0x438] ss:$12 sps:$4 sm:$0xff]  }
 0x184   : > { %5335 = vmatprep.subr.bf16.mxu1 %v6593_v61  ;;  %v5826_v53 = vld [vmem:[#allocation7 + $0x4cc] ss:$12 sps:$4 sm:$0xff]  }
 0x186   : > { %1877 = vmatpush1.bf16.msra.mxu0 %v5720_v44  ;;  %2102 = vmatmul.mubr.bf16.vlgmr.msra.gmra.mrb[8].mxu1 %v7041_v58  ;;  %v5814_v44 = vld [vmem:[#allocation7 + $0x46c] ss:$12 sps:$4 sm:$0xff]  }
 0x187   : > { %1878 = vmatprep.subr.bf16.mxu0 %v5727_v48  ;;  %5336 = vmatpush3.bf16.msra.mxu1 %v5768_v59  ;;  %v5820_v48 = vld [vmem:[#allocation7 + $0x49c] ss:$12 sps:$4 sm:$0xff]   ;;  %v5830_v59 = vld [vmem:[#allocation7 + $0x4f8] ss:$12 sps:$4 sm:$0xff]  }
 0x188   : > { %5351 = vmatprep.mubr.msk.bf16.mxu1 %vm6594_vm0, %v6593_v61  ;;  %5337 = vmatprep.subr.bf16.mxu1 %v6593_v61 }
 0x18a   : > { %1879 = vmatpush1.bf16.msra.mxu0 %v5725_v49  ;;  %v5818_v49 = vld [vmem:[#allocation7 + $0x498] ss:$12 sps:$4 sm:$0xff]  }
 0x18b   : > { %1880 = vmatprep.subr.bf16.mxu0 %v5732_v52  ;;  %5338 = vmatpush3.bf16.msra.mxu1 %v5772_v63  ;;  %v5821_v52 = vld [vmem:[#allocation7 + $0x4b0] ss:$12 sps:$4 sm:$0xff]   ;;  %v5836_v63 = vld [vmem:[#allocation7 + $0x528] ss:$12 sps:$4 sm:$0xff]  }
 0x18c   : > { %5339 = vmatprep.subr.bf16.mxu1 %v6593_v61 }
 0x18e   : > { %1881 = vmatpush1.bf16.msra.mxu0 %v5730_v56  ;;  %v5827_v56 = vld [vmem:[#allocation7 + $0x4e0] ss:$12 sps:$4 sm:$0xff]  }
 0x18f   : > { %1882 = vmatprep.subr.bf16.mxu0 %v5737_v57  ;;  %5340 = vmatpush3.bf16.msra.mxu1 %v5776_v2  ;;  %v5832_v57 = vld [vmem:[#allocation7 + $0x4fc] ss:$12 sps:$4 sm:$0xff]  }
 0x190   : > { %5341 = vmatprep.subr.bf16.mxu1 %v6593_v61  ;;  %v5841_v2 = vld [vmem:[#allocation8 + $0x48] sm:$0xff]  }
 0x192   : > { %1883 = vmatpush1.bf16.msra.mxu0 %v5735_v60  ;;  %v5833_v60 = vld [vmem:[#allocation7 + $0x510] ss:$12 sps:$4 sm:$0xff]  }
 0x193   : > { %1884 = vmatprep.subr.bf16.mxu0 %v5742_v62  ;;  %5342 = vmatpush3.bf16.msra.mxu1 %v5780_v5  ;;  %v5838_v62 = vld [vmem:[#allocation7 + $0x52c] ss:$12 sps:$4 sm:$0xff]   ;;  %v5844_v5 = vld [vmem:[#allocation8 + $0x10] sm:$0xff]  }
 0x194   : > { %5343 = vmatprep.subr.bf16.mxu1 %v6593_v61 }
 0x196   : > { %1885 = vmatpush1.bf16.msra.mxu0 %v5740_v0  ;;  %v5839_v0 = vld [vmem:[#allocation8 + $0x40] sm:$0xff]  }
 0x197   : > { %1886 = vmatprep.subr.bf16.mxu0 %v5747_v1  ;;  %5344 = vmatpush3.bf16.msra.mxu1 %v5784_v8  ;;  %v5840_v1 = vld [vmem:[#allocation8] sm:$0xff]  }
 0x198   : > { %5345 = vmatprep.subr.bf16.mxu1 %v6593_v61  ;;  %v5847_v8 = vld [vmem:[#allocation8 + $0x60] sm:$0xff]  }
 0x19a   : > { %1887 = vmatpush1.bf16.msra.mxu0 %v5745_v3  ;;  %v5842_v3 = vld [vmem:[#allocation8 + $0x8] sm:$0xff]  }
 0x19b   : > { %1888 = vmatprep.subr.bf16.mxu0 %v5752_v4  ;;  %5346 = vmatpush3.bf16.msra.mxu1 %v5788_v11  ;;  %v5843_v4 = vld [vmem:[#allocation8 + $0x50] sm:$0xff]   ;;  %v5850_v11 = vld [vmem:[#allocation8 + $0x28] sm:$0xff]  }
 0x19c   : > { %5347 = vmatprep.subr.bf16.mxu1 %v6593_v61 }
 0x19e   : > { %1889 = vmatpush1.bf16.msra.mxu0 %v5750_v6  ;;  %v5845_v6 = vld [vmem:[#allocation8 + $0x58] sm:$0xff]  }
 0x19f   : > { %1901 = vmatprep.subr.bf16.mxu0 %v5757_v7  ;;  %5348 = vmatpush3.bf16.msra.mxu1 %v5792_v14  ;;  %v5846_v7 = vld [vmem:[#allocation8 + $0x18] sm:$0xff]  }
 0x1a0   : > { %5349 = vmatprep.subr.bf16.mxu1 %v6593_v61 }
 0x1a1   : > { %1891 = vmatmul.mubr.bf16.vlgmr.msra.gmra.mrb[0].mxu0 %v7031_v22  ;;  %v5773_v22 = vld [vmem:[#allocation7 + $0x360] ss:$12 sps:$4 sm:$0xff]  }
 0x1a2   : > { %1902 = vmatpush1.bf16.msra.mxu0 %v5755_v9  ;;  %1933 = vmatprep.mubr.bf16.mxu0 %v7036_v46  ;;  %v5817_v46 = vld [vmem:[#allocation7 + $0x484] ss:$12 sps:$4 sm:$0xff]  }
 0x1a3   : > { %1903 = vmatprep.subr.bf16.mxu0 %v5762_v10  ;;  %5350 = vmatpush3.bf16.msra.mxu1 %v5796_v17  ;;  %v5848_v9 = vld [vmem:[#allocation8 + $0x20] sm:$0xff]   ;;  %v5849_v10 = vld [vmem:[#allocation8 + $0x68] sm:$0xff]  }
 0x1a4   : > { %5255 = vmatprep.subr.bf16.mxu1 %v5839_v0 }
 0x1a6   : > { %1904 = vmatpush1.bf16.msra.mxu0 %v5760_v12  ;;  %5352 = vmatmul.mubr.bf16.vlgmr.msra.gmra.mrb[12].mxu1 %v7058_v23 }
 0x1a7   : > { %1905 = vmatprep.subr.bf16.mxu0 %v5767_v13  ;;  %5256 = vmatpush3.bf16.msra.mxu1 %v5840_v1 }
 0x1a8   : > { %5257 = vmatprep.subr.bf16.mxu1 %v5841_v2 }
 0x1aa   : > { %1906 = vmatpush1.bf16.msra.mxu0 %v5765_v15 }
 0x1ab   : > { %1907 = vmatprep.subr.bf16.mxu0 %v5771_v16  ;;  %5258 = vmatpush3.bf16.msra.mxu1 %v5842_v3 }
 0x1ac   : > { %5259 = vmatprep.subr.bf16.mxu1 %v5843_v4 }
 0x1ae   : > { %1908 = vmatpush1.bf16.msra.mxu0 %v5769_v20  ;;  %v7070_v20 = vsub.s32 2, %v7067_v19 }
 0x1af   : > { %1909 = vmatprep.subr.bf16.mxu0 %v5775_v21  ;;  %5260 = vmatpush3.bf16.msra.mxu1 %v5844_v5  ;;  %v902_v21 = vld [vmem:[%s7296_s3] sm:$0x7] }
 0x1b0   : > { %5261 = vmatprep.subr.bf16.mxu1 %v5845_v6 }
 0x1b2   : > { %1910 = vmatpush1.bf16.msra.mxu0 %v5773_v22  ;;  %v915_v22 = vrot.slane %v902_v21, %v7070_v20 }
 0x1b3   : > { %1911 = vmatprep.subr.bf16.mxu0 %v5779_v24  ;;  %5262 = vmatpush3.bf16.msra.mxu1 %v5846_v7 }
 0x1b4   : > { %5263 = vmatprep.subr.bf16.mxu1 %v5847_v8 }
 0x1b6   : > { %1912 = vmatpush1.bf16.msra.mxu0 %v5777_v25 }
 0x1b7   : > { %1913 = vmatprep.subr.bf16.mxu0 %v5783_v26  ;;  %5264 = vmatpush3.bf16.msra.mxu1 %v5848_v9 }
 0x1b8   : > { %5265 = vmatprep.subr.bf16.mxu1 %v5849_v10  ;;  %v5855_v10 = vld [vmem:[#allocation8 + $0x80] sm:$0xff]  }
 0x1ba   : > { %1914 = vmatpush1.bf16.msra.mxu0 %v5781_v27 }
 0x1bb   : > { %1915 = vmatprep.subr.bf16.mxu0 %v5787_v28  ;;  %5266 = vmatpush3.bf16.msra.mxu1 %v5850_v11  ;;  %v5856_v11 = vld [vmem:[#allocation8 + $0x88] sm:$0xff]  }
 0x1be   : > { %1916 = vmatpush1.bf16.msra.mxu0 %v5785_v29 }
 0x1bf   : > { %1917 = vmatprep.subr.bf16.mxu0 %v5791_v30 }
 0x1c2   : > { %1918 = vmatpush1.bf16.msra.mxu0 %v5789_v31 }
 0x1c3   : > { %1919 = vmatprep.subr.bf16.mxu0 %v5795_v32 }
 0x1c6   : > { %1920 = vmatpush1.bf16.msra.mxu0 %v5793_v33  ;;  %v5851_v33 = vld [vmem:[#allocation8 + $0x70] sm:$0xff]  }
 0x1c7   : > { %1921 = vmatprep.subr.bf16.mxu0 %v5799_v34  ;;  %v5852_v34 = vld [vmem:[#allocation8 + $0x30] sm:$0xff]   ;;  %5267 = vmatprep.subr.bf16.mxu1 %v5851_v33  ;;  %v5881_v33 = vld [vmem:[#allocation10 + $0x60] ss:$8 sps:$4 sm:$0xff]  }
 0x1c8   : > { %5268 = vmatpush3.bf16.msra.mxu1 %v5852_v34  ;;  %v5886_v34 = vld [vmem:[#allocation10 + $0x74] ss:$8 sps:$4 sm:$0xff]  }
 0x1ca   : > { %1922 = vmatpush1.bf16.msra.mxu0 %v5797_v35  ;;  %v5853_v35 = vld [vmem:[#allocation8 + $0x78] sm:$0xff]  }
 0x1cb   : > { %1923 = vmatprep.subr.bf16.mxu0 %v5802_v36  ;;  %v5854_v36 = vld [vmem:[#allocation8 + $0x38] sm:$0xff]   ;;  %5269 = vmatprep.subr.bf16.mxu1 %v5853_v35 }
 0x1cc   : > { %5270 = vmatpush3.bf16.msra.mxu1 %v5854_v36  ;;  %v5884_v35 = vld [vmem:[#allocation10 + $0x70] ss:$8 sps:$4 sm:$0xff]   ;;  %v5887_v36 = vld [vmem:[#allocation11] sm:$0xff]  }
 0x1cd   : > { %5355 = vmatprep.subr.bf16.mxu1 %v6593_v61 }
 0x1ce   : > { %1924 = vmatpush1.bf16.msra.mxu0 %v5800_v37 }
 0x1cf   : > { %1925 = vmatprep.subr.bf16.mxu0 %v5805_v38 }
 0x1d2   : > { %1926 = vmatpush1.bf16.msra.mxu0 %v5803_v39 }
 0x1d3   : > { %1927 = vmatprep.subr.bf16.mxu0 %v5808_v40 }
 0x1d6   : > { %1928 = vmatpush1.bf16.msra.mxu0 %v5806_v41 }
 0x1d7   : > { %1929 = vmatprep.subr.bf16.mxu0 %v5811_v42 }
 0x1da   : > { %1930 = vmatpush1.bf16.msra.mxu0 %v5809_v43 }
 0x1db   : > { %1931 = vmatprep.subr.bf16.mxu0 %v5814_v44 }
 0x1de   : > { %1932 = vmatpush1.bf16.msra.mxu0 %v5812_v45 }
 0x1df   : > { %1944 = vmatprep.subr.bf16.mxu0 %v5817_v46 }
 0x1e1   : > { %1934 = vmatmul.mubr.bf16.vlgmr.msra.gmra.mrb[0].mxu0 %v7041_v58  ;;  %v5835_v58 = vld [vmem:[#allocation7 + $0x514] ss:$12 sps:$4 sm:$0xff]  }
 0x1e2   : > { %1945 = vmatpush1.bf16.msra.mxu0 %v5815_v47  ;;  %1976 = vmatprep.mubr.bf16.mxu0 %v6595_v51 }
 0x1e3   : > { %1946 = vmatprep.subr.bf16.mxu0 %v5820_v48 }
 0x1e6   : > { %1947 = vmatpush1.bf16.msra.mxu0 %v5818_v49 }
 0x1e7   : > { %1948 = vmatprep.subr.bf16.mxu0 %v5823_v50 }
 0x1ea   : > { %1949 = vmatpush1.bf16.msra.mxu0 %v5821_v52 }
 0x1eb   : > { %1950 = vmatprep.subr.bf16.mxu0 %v5826_v53 }
 0x1ee   : > { %1951 = vmatpush1.bf16.msra.mxu0 %v5824_v54 }
 0x1ef   : > { %1952 = vmatprep.subr.bf16.mxu0 %v5829_v55  ;;  %v7078_v55 = vsub.s32 0, %v7067_v19 }
 0x1f2   : > { %1953 = vmatpush1.bf16.msra.mxu0 %v5827_v56  ;;  %v7081_v56 = vsub.s32 1, %v7067_v19 }
 0x1f3   : > { %1954 = vmatprep.subr.bf16.mxu0 %v5832_v57  ;;  %v907_v57 = vrot.slane %v902_v21, %v7078_v55 }
 0x1f6   : > { %1955 = vmatpush1.bf16.msra.mxu0 %v5830_v59  ;;  %v911_v59 = vrot.slane %v902_v21, %v7081_v56  ;;  %v5865_v21 = vld [vmem:[#allocation10 + $0x4] ss:$8 sps:$4 sm:$0xff]  }
 0x1f7   : > { %1956 = vmatprep.subr.bf16.mxu0 %v5835_v58 }
 0x1fa   : > { %1957 = vmatpush1.bf16.msra.mxu0 %v5833_v60 }
 0x1fb   : > { %1958 = vmatprep.subr.bf16.mxu0 %v5838_v62 }
 0x1fe   : > { %1959 = vmatpush1.bf16.msra.mxu0 %v5836_v63 }
 0x1ff   : > { %5375 = vmatprep.subr.bf16.mxu0 %v6593_v61 }
 0x201   : > { %1977 = vmatmul.mubr.bf16.vlgmr.msra.gmra.mrb[0].mxu0 %v7058_v23 }
 0x202   : > { %5391 = vmatprep.mubr.msk.bf16.mxu0 %vm6594_vm0, %v6593_v61  ;;  %5376 = vmatpush3.bf16.msra.mxu0 %v5887_v36 }
 0x203   : > { %5377 = vmatprep.subr.bf16.mxu0 %v6593_v61 }
 0x218   : > { %v5196_v12 = vpop.f32.mrb[0].mxu1 }
 0x219   : > { %v5197_v13 = vpop.f32.mrb[1].mxu1 }
 0x21a   : > { %v5198_v14 = vadd.f32 %v5197_v13, %v5196_v12  ;;  %v5199_v15 = vpop.f32.mrb[2].mxu1  ;;  %v5857_v12 = vld [vmem:[#allocation8 + $0x90] sm:$0xff]   ;;  %v5858_v13 = vld [vmem:[#allocation8 + $0x98] sm:$0xff]  }
 0x21b   : > { %v5200_v16 = vpop.f32.mrb[3].mxu1 }
 0x21c   : > { %v5201_v17 = vadd.f32 %v5200_v16, %v5199_v15  ;;  %v2022_v23 = vadd.f32 %v5198_v14, %v915_v22  ;;  %v5859_v14 = vld [vmem:[#allocation8 + $0xa0] sm:$0xff]   ;;  %v5860_v15 = vld [vmem:[#allocation8 + $0xa8] sm:$0xff]   ;;  %v5861_v16 = vld [vmem:[#allocation8 + $0xb0] sm:$0xff]  }
 0x21e   : > { %v2025_v26 = vadd.f32 %v5201_v17, %v915_v22  ;;  %v5862_v17 = vld [vmem:[#allocation8 + $0xb8] sm:$0xff]  }
 0x21f   : > { %v5868_v22 = vld [vmem:[#allocation10 + $0x14] ss:$8 sps:$4 sm:$0xff]  }
 0x239   : > { %v5218_v24 = vpop.f32.mrb[4].mxu1 }
 0x23a   : > { %v5219_v25 = vpop.f32.mrb[5].mxu1 }
 0x23b   : > { %v5220_v27 = vadd.f32 %v5219_v25, %v5218_v24  ;;  %v5221_v28 = vpop.f32.mrb[6].mxu1  ;;  %v5871_v24 = vld [vmem:[#allocation10 + $0x24] ss:$8 sps:$4 sm:$0xff]   ;;  %v5869_v25 = vld [vmem:[#allocation10 + $0x20] ss:$8 sps:$4 sm:$0xff]  }
 0x23c   : > { %v5222_v29 = vpop.f32.mrb[7].mxu1 }
 0x23d   : > { %v2063_v30 = vadd.f32 %v5220_v27, %v2022_v23  ;;  %v5223_v31 = vadd.f32 %v5222_v29, %v5221_v28  ;;  %v5866_v23 = vld [vmem:[#allocation10 + $0x10] ss:$8 sps:$4 sm:$0xff]   ;;  %v5877_v28 = vld [vmem:[#allocation10 + $0x44] ss:$8 sps:$4 sm:$0xff]   ;;  %v5875_v29 = vld [vmem:[#allocation10 + $0x40] ss:$8 sps:$4 sm:$0xff]  }
 0x23e   : > { %v5872_v27 = vld [vmem:[#allocation10 + $0x30] ss:$8 sps:$4 sm:$0xff]  }
 0x23f   : > { %v2066_v32 = vadd.f32 %v5223_v31, %v2025_v26  ;;  %v5874_v26 = vld [vmem:[#allocation10 + $0x34] ss:$8 sps:$4 sm:$0xff]   ;;  %v5878_v31 = vld [vmem:[#allocation10 + $0x50] ss:$8 sps:$4 sm:$0xff]  }
 0x259   : > { %v5240_v37 = vpop.f32.mrb[8].mxu1 }
 0x25a   : > { %v5241_v38 = vpop.f32.mrb[9].mxu1 }
 0x25b   : > { %v5242_v39 = vadd.f32 %v5241_v38, %v5240_v37  ;;  %v5243_v40 = vpop.f32.mrb[10].mxu1 }
 0x25c   : > { %v5244_v41 = vpop.f32.mrb[11].mxu1 }
 0x25d   : > { %v5245_v42 = vadd.f32 %v5244_v41, %v5243_v40  ;;  %v2104_v43 = vadd.f32 %v5242_v39, %v2063_v30  ;;  %v5880_v30 = vld [vmem:[#allocation10 + $0x54] ss:$8 sps:$4 sm:$0xff]  }
 0x25f   : > { %v2107_v44 = vadd.f32 %v5245_v42, %v2066_v32  ;;  %v5883_v32 = vld [vmem:[#allocation10 + $0x64] ss:$8 sps:$4 sm:$0xff]  }
 0x279   : > { %v2144_v45 = vpop.f32.mrb[12].mxu1 }
 0x27a   : > { %v2145_v46 = vadd.f32 %v2144_v45, %v2104_v43  ;;  %v5353_v47 = vpop.f32.mrb[13].mxu1  ;;  %v4929_v43 = vld [vmem:[%s7359_s2] ss:$0 sm:$0xff] }
 0x27b   : > { %v2147_v48 = vpop.f32.mrb[14].mxu1 }
 0x27c   : > { %v2153_v49 = vmax.f32 %v2145_v46, 0.0  ;;  %v2148_v50 = vadd.f32 %v2147_v48, %v2107_v44  ;;  %v5354_v52 = vpop.f32.mrb[15].mxu1 }
 0x27e   : > { %v2156_v53 = vmax.f32 %v2148_v50, 0.0 }
 0x280   : > { %v2159_v54 = vpack.c.bf16 %v2156_v53, %v2153_v49 }
 0x2d4   : > { %v1978_v58 = vpop.f32.mrb[0].mxu0 }
 0x2d5   : > { %v5435_v60 = vadd.f32 %v1978_v58, %v907_v57  ;;  %v1980_v62 = vpop.f32.mrb[1].mxu0  ;;  %v5889_v58 = vld [vmem:[#allocation11 + $0x10] sm:$0xff]  }
 0x2d6   : > { %v5436_v63 = vadd.f32 %v1980_v62, %v911_v59  ;;  %v1982_v0 = vpop.f32.mrb[2].mxu0  ;;  %v5891_v62 = vld [vmem:[#allocation11 + $0x20] sm:$0xff]  }
 0x2d7   : > { %v5437_v1 = vadd.f32 %v1982_v0, %v907_v57  ;;  %v1984_v2 = vpop.f32.mrb[3].mxu0  ;;  %v2151_v4 = vmax.f32 %v5435_v60, 0.0  ;;  %v5890_v60 = vld [vmem:[#allocation11 + $0x18] sm:$0xff]   ;;  %v5893_v0 = vld [vmem:[#allocation11 + $0x30] sm:$0xff]  }
 0x2d8   : > { %v5438_v3 = vadd.f32 %v1984_v2, %v911_v59  ;;  %v2152_v6 = vmax.f32 %v5436_v63, 0.0  ;;  %v5888_v59 = vld [vmem:[#allocation11 + $0x8] sm:$0xff]  }
 0x2d9   : > { %v2154_v5 = vmax.f32 %v5437_v1, 0.0  ;;  %5378 = vmatpush3.bf16.msra.mxu0 %v5888_v59  ;;  %v5892_v63 = vld [vmem:[#allocation11 + $0x28] sm:$0xff]   ;;  %v5894_v1 = vld [vmem:[#allocation11 + $0x38] sm:$0xff]  }
 0x2da   : > { %v2155_v7 = vmax.f32 %v5438_v3, 0.0  ;;  %5379 = vmatprep.subr.bf16.mxu0 %v6593_v61  ;;  %v5895_v2 = vld [vmem:[#allocation13] ss:$12 sps:$4 sm:$0xff]   ;;  %v5897_v3 = vld [vmem:[#allocation13 + $0x4] ss:$12 sps:$4 sm:$0xff]  }
 0x2db   : > { %v2157_v8 = vpack.c.bf16 %v2154_v5, %v2151_v4  ;;  %v5901_v4 = vld [vmem:[#allocation13 + $0x1c] ss:$12 sps:$4 sm:$0xff]   ;;  %v5899_v5 = vld [vmem:[#allocation13 + $0x18] ss:$12 sps:$4 sm:$0xff]  }
 0x2dc   : > { %v2158_v9 = vpack.c.bf16 %v2155_v7, %v2152_v6  ;;  %v5905_v6 = vld [vmem:[#allocation13 + $0x34] ss:$12 sps:$4 sm:$0xff]   ;;  %v5903_v7 = vld [vmem:[#allocation13 + $0x30] ss:$12 sps:$4 sm:$0xff]  }
 0x2dd   : > { %5380 = vmatpush3.bf16.msra.mxu0 %v5889_v58 }
 0x2de   : > { %2391 = vmatprep.mubr.bf16.mxu1 %v2158_v9  ;;  %5381 = vmatprep.subr.bf16.mxu0 %v6593_v61  ;;  %v5907_v9 = vld [vmem:[#allocation13 + $0x48] ss:$12 sps:$4 sm:$0xff]  }
 0x2df   : > { %2392 = vmatmul.mubr.bf16.vlgmr.msra.gmra.mrb[16].mxu1 %v2157_v8  ;;  %v5909_v8 = vld [vmem:[#allocation13 + $0x4c] ss:$12 sps:$4 sm:$0xff]  }
 0x2e0   : > { %5356 = vmatpush3.bf16.msra.mxu1 %v5855_v10  ;;  %5371 = vmatprep.mubr.msk.bf16.mxu1 %vm6594_vm0, %v6593_v61  ;;  %v5913_v10 = vld [vmem:[#allocation13 + $0x64] ss:$12 sps:$4 sm:$0xff]  }
 0x2e1   : > { %5357 = vmatprep.subr.bf16.mxu1 %v6593_v61  ;;  %5382 = vmatpush3.bf16.msra.mxu0 %v5890_v60 }
 0x2e2   : > { %5383 = vmatprep.subr.bf16.mxu0 %v6593_v61 }
 0x2e4   : > { %5358 = vmatpush3.bf16.msra.mxu1 %v5856_v11  ;;  %v5911_v11 = vld [vmem:[#allocation13 + $0x60] ss:$12 sps:$4 sm:$0xff]  }
 0x2e5   : > { %5359 = vmatprep.subr.bf16.mxu1 %v6593_v61  ;;  %5384 = vmatpush3.bf16.msra.mxu0 %v5891_v62 }
 0x2e6   : > { %5385 = vmatprep.subr.bf16.mxu0 %v6593_v61 }
 0x2e8   : > { %5360 = vmatpush3.bf16.msra.mxu1 %v5857_v12  ;;  %v5917_v12 = vld [vmem:[#allocation13 + $0x7c] ss:$12 sps:$4 sm:$0xff]  }
 0x2e9   : > { %5361 = vmatprep.subr.bf16.mxu1 %v6593_v61  ;;  %5386 = vmatpush3.bf16.msra.mxu0 %v5892_v63 }
 0x2ea   : > { %5387 = vmatprep.subr.bf16.mxu0 %v6593_v61 }
 0x2ec   : > { %5362 = vmatpush3.bf16.msra.mxu1 %v5858_v13  ;;  %v5915_v13 = vld [vmem:[#allocation13 + $0x78] ss:$12 sps:$4 sm:$0xff]  }
 0x2ed   : > { %5363 = vmatprep.subr.bf16.mxu1 %v6593_v61  ;;  %5388 = vmatpush3.bf16.msra.mxu0 %v5893_v0 }
 0x2ee   : > { %5389 = vmatprep.subr.bf16.mxu0 %v6593_v61 }
 0x2f0   : > { %5364 = vmatpush3.bf16.msra.mxu1 %v5859_v14  ;;  %v2460_v14 = vld [vmem:[%s7360_s26] sm:$0x3]  ;;  %s7192_s26 = scalar_lea.hbm %s7364_s6, %s5480_s23 }
 0x2f1   : > { %5365 = vmatprep.subr.bf16.mxu1 %v6593_v61  ;;  %5390 = vmatpush3.bf16.msra.mxu0 %v5894_v1 }
 0x2f2   : > { %5395 = vmatprep.subr.bf16.mxu0 %v6593_v61 }
 0x2f4   : > { %5366 = vmatpush3.bf16.msra.mxu1 %v5860_v15  ;;  %v2465_v15 = vrot.slane %v2460_v14, %v7078_v55 }
 0x2f5   : > { %5367 = vmatprep.subr.bf16.mxu1 %v6593_v61 }
 0x2f8   : > { %5368 = vmatpush3.bf16.msra.mxu1 %v5861_v16  ;;  %v2469_v16 = vrot.slane %v2460_v14, %v7081_v56  ;;  %v5947_v14 = vld [vmem:[#allocation14 + $0xac] ss:$28 sps:$4 sm:$0xff]  }
 0x2f9   : > { %5369 = vmatprep.subr.bf16.mxu1 %v6593_v61 }
 0x2fc   : > { %5370 = vmatpush3.bf16.msra.mxu1 %v5862_v17 }
 0x2fd   : > { %2552 = vmatprep.subr.bf16.mxu1 %v5865_v21 }
 0x2ff   : > { %5372 = vmatmul.mubr.bf16.vlgmr.msra.gmra.mrb[20].mxu1 %v2159_v54 }
 0x300   : > { %2584 = vmatprep.mubr.bf16.mxu1 %v6595_v51  ;;  %2553 = vmatpush1.bf16.msra.mxu1 %v5863_v18 }
 0x301   : > { %2554 = vmatprep.subr.bf16.mxu1 %v5868_v22 }
 0x304   : > { %2555 = vmatpush1.bf16.msra.mxu1 %v5866_v23 }
 0x305   : > { %2556 = vmatprep.subr.bf16.mxu1 %v5871_v24 }
 0x308   : > { %2557 = vmatpush1.bf16.msra.mxu1 %v5869_v25 }
 0x309   : > { %2558 = vmatprep.subr.bf16.mxu1 %v5874_v26 }
 0x30c   : > { %2559 = vmatpush1.bf16.msra.mxu1 %v5872_v27 }
 0x30d   : > { %2560 = vmatprep.subr.bf16.mxu1 %v5877_v28 }
 0x310   : > { %2561 = vmatpush1.bf16.msra.mxu1 %v5875_v29 }
 0x311   : > { %2562 = vmatprep.subr.bf16.mxu1 %v5880_v30 }
 0x314   : > { %2563 = vmatpush1.bf16.msra.mxu1 %v5878_v31  ;;  %v2601_v31 = vld [vmem:[%s7001_s15] sm:$0xff] }
 0x315   : > { %2564 = vmatprep.subr.bf16.mxu1 %v5883_v32 }
 0x318   : > { %2565 = vmatpush1.bf16.msra.mxu1 %v5881_v33  ;;  %v2602_v33 = vld [vmem:[%s7001_s15 + $0x8] sm:$0xff] }
 0x319   : > { %2566 = vmatprep.subr.bf16.mxu1 %v5886_v34 }
 0x31c   : > { %2567 = vmatpush1.bf16.msra.mxu1 %v5884_v35 }
 0x31d   : > { %2900 = vmatprep.subr.bf16.mxu1 %v5897_v3  ;;  %v5927_v3 = vld [vmem:[#allocation14] ss:$28 sps:$4 sm:$0xff]  }
 0x3b2   : > { %v5271_v37 = vpop.f32.mrb[16].mxu1 }
 0x3b3   : > { %v5272_v38 = vpop.f32.mrb[17].mxu1 }
 0x3b4   : > { %v5273_v39 = vadd.f32 %v5272_v38, %v5271_v37  ;;  %v5274_v40 = vpop.f32.mrb[18].mxu1 }
 0x3b5   : > { %v5275_v41 = vpop.f32.mrb[19].mxu1 }
 0x3b6   : > { %v5276_v42 = vadd.f32 %v5275_v41, %v5274_v40  ;;  %v2394_v44 = vadd.f32 %v5273_v39, %v4929_v43  ;;  %v5898_v39 = vld [vmem:[#allocation13 + $0x8] ss:$12 sps:$4 sm:$0xff]   ;;  %v5902_v41 = vld [vmem:[#allocation13 + $0x20] ss:$12 sps:$4 sm:$0xff]  }
 0x3b8   : > { %v2397_v48 = vadd.f32 %v5276_v42, %v4929_v43  ;;  %v5906_v42 = vld [vmem:[#allocation13 + $0x38] ss:$12 sps:$4 sm:$0xff]   ;;  %v5910_v43 = vld [vmem:[#allocation13 + $0x50] ss:$12 sps:$4 sm:$0xff]  }
 0x3d2   : > { %v2434_v45 = vpop.f32.mrb[20].mxu1 }
 0x3d3   : > { %v2435_v46 = vadd.f32 %v2434_v45, %v2394_v44  ;;  %v5373_v47 = vpop.f32.mrb[21].mxu1  ;;  %v5914_v44 = vld [vmem:[#allocation13 + $0x68] ss:$12 sps:$4 sm:$0xff]   ;;  %v5918_v45 = vld [vmem:[#allocation13 + $0x80] ss:$12 sps:$4 sm:$0xff]  }
 0x3d4   : > { %v2437_v49 = vpop.f32.mrb[22].mxu1  ;;  %v5919_v47 = vld [vmem:[#allocation13 + $0x90] ss:$12 sps:$4 sm:$0xff]  }
 0x3d5   : > { %v2438_v50 = vadd.f32 %v2437_v49, %v2397_v48  ;;  %v5374_v52 = vpop.f32.mrb[23].mxu1  ;;  %v2441_v53 = vmax.f32 %v2435_v46, 0.0  ;;  %v5921_v46 = vld [vmem:[#allocation13 + $0x94] ss:$12 sps:$4 sm:$0xff]   ;;  %v5922_v48 = vld [vmem:[#allocation13 + $0x98] ss:$12 sps:$4 sm:$0xff]  }
 0x3d6   : > { %v5925_v49 = vld [vmem:[#allocation13 + $0xac] ss:$12 sps:$4 sm:$0xff]   ;;  %v5926_v52 = vld [vmem:[#allocation13 + $0xb0] ss:$12 sps:$4 sm:$0xff]  }
 0x3d7   : > { %v2442_v54 = vmax.f32 %v2438_v50, 0.0  ;;  %v5923_v50 = vld [vmem:[#allocation13 + $0xa8] ss:$12 sps:$4 sm:$0xff]  }
 0x3d9   : > { %v2443_v57 = vpack.c.bf16 %v2442_v54, %v2441_v53  ;;  %v5929_v53 = vld [vmem:[#allocation14 + $0x4] ss:$28 sps:$4 sm:$0xff]   ;;  %v5932_v54 = vld [vmem:[#allocation14 + $0xc] ss:$28 sps:$4 sm:$0xff]  }
 0x3db   : > { %2585 = vmatmul.mubr.bf16.vlgmr.msra.gmra.mrb[24].mxu1 %v2443_v57  ;;  %v4970_v57 = vld [vmem:[%s7361_s11] ss:$0 sm:$0xff]  ;;  %s6461_s11 = scalar_lea.vmem %s6460_s5, 1536 }
 0x3dc   : > { %2932 = vmatprep.mubr.bf16.mxu1 %v6595_v51  ;;  %2901 = vmatpush1.bf16.msra.mxu1 %v5895_v2 }
 0x3dd   : > { %2902 = vmatprep.subr.bf16.mxu1 %v5901_v4  ;;  %v5930_v4 = vld [vmem:[#allocation14 + $0x8] ss:$28 sps:$4 sm:$0xff]  }
 0x3e0   : > { %2903 = vmatpush1.bf16.msra.mxu1 %v5899_v5 }
 0x3e1   : > { %2904 = vmatprep.subr.bf16.mxu1 %v5905_v6  ;;  %v5935_v6 = vld [vmem:[#allocation14 + $0x3c] ss:$28 sps:$4 sm:$0xff]  }
 0x3e4   : > { %2905 = vmatpush1.bf16.msra.mxu1 %v5903_v7  ;;  %v5938_v7 = vld [vmem:[#allocation14 + $0x44] ss:$28 sps:$4 sm:$0xff]  }
 0x3e5   : > { %2906 = vmatprep.subr.bf16.mxu1 %v5909_v8  ;;  %v5933_v8 = vld [vmem:[#allocation14 + $0x38] ss:$28 sps:$4 sm:$0xff]  }
 0x3e8   : > { %2907 = vmatpush1.bf16.msra.mxu1 %v5907_v9  ;;  %v5936_v9 = vld [vmem:[#allocation14 + $0x40] ss:$28 sps:$4 sm:$0xff]  }
 0x3e9   : > { %2908 = vmatprep.subr.bf16.mxu1 %v5913_v10  ;;  %v5941_v10 = vld [vmem:[#allocation14 + $0x74] ss:$28 sps:$4 sm:$0xff]  }
 0x3ec   : > { %2909 = vmatpush1.bf16.msra.mxu1 %v5911_v11  ;;  %v5944_v11 = vld [vmem:[#allocation14 + $0x7c] ss:$28 sps:$4 sm:$0xff]  }
 0x3ed   : > { %2910 = vmatprep.subr.bf16.mxu1 %v5917_v12  ;;  %v5939_v12 = vld [vmem:[#allocation14 + $0x70] ss:$28 sps:$4 sm:$0xff]  }
 0x3f0   : > { %2911 = vmatpush1.bf16.msra.mxu1 %v5915_v13  ;;  %v5942_v13 = vld [vmem:[#allocation14 + $0x78] ss:$28 sps:$4 sm:$0xff]  }
 0x3f1   : > { %2912 = vmatprep.subr.bf16.mxu1 %v5921_v46  ;;  %v5987_v46 = vld [vmem:[#allocation14 + $0x230] ss:$28 sps:$4 sm:$0xff]  }
 0x3f4   : > { %2913 = vmatpush1.bf16.msra.mxu1 %v5919_v47  ;;  %v5990_v47 = vld [vmem:[#allocation14 + $0x238] ss:$28 sps:$4 sm:$0xff]  }
 0x3f5   : > { %2914 = vmatprep.subr.bf16.mxu1 %v5925_v49  ;;  %v5998_v49 = vld [vmem:[#allocation14 + $0x274] ss:$28 sps:$4 sm:$0xff]  }
 0x3f8   : > { %2915 = vmatpush1.bf16.msra.mxu1 %v5923_v50  ;;  %v5993_v50 = vld [vmem:[#allocation14 + $0x268] ss:$28 sps:$4 sm:$0xff]  }
 0x3f9   : > { %4086 = vmatprep.subr.bf16.mxu1 %v5929_v53  ;;  %v6001_v53 = vld [vmem:[#allocation14 + $0x2a4] ss:$28 sps:$4 sm:$0xff]  }
 0x4ae   : > { %v2586_v17 = vpop.f32.mrb[24].mxu1 }
 0x4af   : > { %v2587_v18 = vadd.f32 %v2586_v17, %v2465_v15  ;;  %v2588_v21 = vpop.f32.mrb[25].mxu1  ;;  %v5948_v17 = vld [vmem:[#allocation14 + $0xb0] ss:$28 sps:$4 sm:$0xff]  }
 0x4b0   : > { %v2589_v22 = vadd.f32 %v2588_v21, %v2469_v16  ;;  %v2590_v23 = vpop.f32.mrb[26].mxu1  ;;  %v5956_v21 = vld [vmem:[#allocation14 + $0xec] ss:$28 sps:$4 sm:$0xff]  }
 0x4b1   : > { %4511 = vst [vmem:[%s7113_s10 + $0x8] sm:$0xff] %v2587_v18  ;;  %v2591_v24 = vadd.f32 %v2590_v23, %v2465_v15  ;;  %v2592_v25 = vpop.f32.mrb[27].mxu1  ;;  %v5950_v15 = vld [vmem:[#allocation14 + $0xb4] ss:$28 sps:$4 sm:$0xff]   ;;  %v5954_v23 = vld [vmem:[#allocation14 + $0xe8] ss:$28 sps:$4 sm:$0xff]  }
 0x4b2   : > { %v2595_v26 = vmul.f32 0.5, %v2589_v22  ;;  %4512 = vst [vmem:[%s7113_s10 + $0x10] sm:$0xff] %v2589_v22  ;;  %v2593_v27 = vadd.f32 %v2592_v25, %v2469_v16  ;;  %v5945_v16 = vld [vmem:[#allocation14 + $0xa8] ss:$28 sps:$4 sm:$0xff]   ;;  %v5951_v22 = vld [vmem:[#allocation14 + $0xe0] ss:$28 sps:$4 sm:$0xff]  }
 0x4b3   : > { %4514 = vst [vmem:[%s7113_s10 + $0x20] sm:$0xff] %v2591_v24  ;;  %v5962_v25 = vld [vmem:[#allocation14 + $0x124] ss:$28 sps:$4 sm:$0xff]  }
 0x4b4   : > { %v2597_v28 = vmul.f32 1.442695, %v2595_v26  ;;  %v2596_v29 = vmul.f32 0.5, %v2593_v27  ;;  %4515 = vst [vmem:[%s7113_s10 + $0x28] sm:$0xff] %v2593_v27  ;;  %v5957_v26 = vld [vmem:[#allocation14 + $0x118] ss:$28 sps:$4 sm:$0xff]  }
 0x4b5   : > { %v5960_v27 = vld [vmem:[#allocation14 + $0x120] ss:$28 sps:$4 sm:$0xff]  }
 0x4b6   : > { %6167 = vpow2.f32 %v2597_v28  ;;  %v2599_v30 = vmul.f32 1.442695, %v2596_v29  ;;  %v5965_v28 = vld [vmem:[#allocation14 + $0x154] ss:$28 sps:$4 sm:$0xff]   ;;  %v5968_v29 = vld [vmem:[#allocation14 + $0x15c] ss:$28 sps:$4 sm:$0xff]  }
 0x4b8   : > { %6169 = vpow2.f32 %v2599_v30  ;;  %v5963_v30 = vld [vmem:[#allocation14 + $0x150] ss:$28 sps:$4 sm:$0xff]  }
 0x4c0   : > { %v6168_v32 = vpop.eup %6167 }
 0x4c1   : > { %v2603_v34 = vmul.f32 %v6168_v32, %v2601_v31  ;;  %v5966_v31 = vld [vmem:[#allocation14 + $0x158] ss:$28 sps:$4 sm:$0xff]   ;;  %v5971_v32 = vld [vmem:[#allocation14 + $0x18c] ss:$28 sps:$4 sm:$0xff]  }
 0x4c2   : > { %v6170_v35 = vpop.eup %6169 }
 0x4c3   : > { %v2604_v36 = vmul.f32 %v6170_v35, %v2602_v33  ;;  %v2605_v37 = vadd.f32 %v2603_v34, %v2587_v18  ;;  %v5953_v18 = vld [vmem:[#allocation14 + $0xe4] ss:$28 sps:$4 sm:$0xff]   ;;  %v5974_v33 = vld [vmem:[#allocation14 + $0x194] ss:$28 sps:$4 sm:$0xff]  }
 0x4c4   : > { %v5969_v34 = vld [vmem:[#allocation14 + $0x188] ss:$28 sps:$4 sm:$0xff]   ;;  %v5972_v35 = vld [vmem:[#allocation14 + $0x190] ss:$28 sps:$4 sm:$0xff]  }
 0x4c5   : > { %v2606_v38 = vadd.f32 %v2604_v36, %v2591_v24  ;;  %4510 = vst [vmem:[%s7113_s10] sm:$0xff] %v2605_v37  ;;  %v5959_v24 = vld [vmem:[#allocation14 + $0x11c] ss:$28 sps:$4 sm:$0xff]   ;;  %v5977_v36 = vld [vmem:[#allocation14 + $0x1c4] ss:$28 sps:$4 sm:$0xff]  }
 0x4c7   : > { %v2607_v40 = vpack.c.bf16 %v2606_v38, %v2605_v37  ;;  %4513 = vst [vmem:[%s7113_s10 + $0x18] sm:$0xff] %v2606_v38  ;;  %v5980_v37 = vld [vmem:[#allocation14 + $0x1cc] ss:$28 sps:$4 sm:$0xff]   ;;  %v5975_v38 = vld [vmem:[#allocation14 + $0x1c0] ss:$28 sps:$4 sm:$0xff]   ;;  %s6455_s10 = scalar_lea.vmem %s7186_s17, 768 }
 0x4c8   : > { %p6456_p7 = scmp.ne.s32.totalorder %s7186_s17, %s6455_s10  ;;  %p6463_p8 = scmp.lt.s32.totalorder %s6461_s11, %s6455_s10 }
 0x4c9   : > { %5392 = vmatmul.mubr.bf16.vlgmr.msra.gmra.mrb[4].mxu0 %v2607_v40  ;;  %v5983_v40 = vld [vmem:[#allocation14 + $0x1fc] ss:$28 sps:$4 sm:$0xff]  }
 0x4ca   : > { %5396 = vmatpush3.bf16.msra.mxu0 %v5898_v39  ;;  %5411 = vmatprep.mubr.msk.bf16.mxu0 %vm6594_vm0, %v6593_v61  ;;  %v5978_v39 = vld [vmem:[#allocation14 + $0x1c8] ss:$28 sps:$4 sm:$0xff]   ;;  %p6457_p6 = pnand %p6456_p7, %p7365_p9  ;;  %p6464_p4 = por %p6463_p8, %p6462_p5 }
 0x4cb   : > { %5397 = vmatprep.subr.bf16.mxu0 %v6593_v61 }
 0x4cc   : > { %p6458_p2 = pneg %p6457_p6 }
 0x4ce   : > { %5398 = vmatpush3.bf16.msra.mxu0 %v5902_v41  ;;  %v5986_v41 = vld [vmem:[#allocation14 + $0x204] ss:$28 sps:$4 sm:$0xff]   ;;  %p6465_p1 = pnand %p6464_p4, %p6458_p2 }
 0x4cf   : > { %5399 = vmatprep.subr.bf16.mxu0 %v6593_v61 }
 0x4d2   : > { %5400 = vmatpush3.bf16.msra.mxu0 %v5906_v42  ;;  %v5981_v42 = vld [vmem:[#allocation14 + $0x1f8] ss:$28 sps:$4 sm:$0xff]  }
 0x4d3   : > { %5401 = vmatprep.subr.bf16.mxu0 %v6593_v61 }
 0x4d6   : > { %5402 = vmatpush3.bf16.msra.mxu0 %v5910_v43  ;;  %v5984_v43 = vld [vmem:[#allocation14 + $0x200] ss:$28 sps:$4 sm:$0xff]  }
 0x4d7   : > { %5403 = vmatprep.subr.bf16.mxu0 %v6593_v61 }
 0x4da   : > { %5404 = vmatpush3.bf16.msra.mxu0 %v5914_v44  ;;  %v5989_v44 = vld [vmem:[#allocation14 + $0x234] ss:$28 sps:$4 sm:$0xff]  }
 0x4db   : > { %5405 = vmatprep.subr.bf16.mxu0 %v6593_v61 }
 0x4de   : > { %5406 = vmatpush3.bf16.msra.mxu0 %v5918_v45  ;;  %v5992_v45 = vld [vmem:[#allocation14 + $0x23c] ss:$28 sps:$4 sm:$0xff]  }
 0x4df   : > { %5407 = vmatprep.subr.bf16.mxu0 %v6593_v61 }
 0x4e2   : > { %5408 = vmatpush3.bf16.msra.mxu0 %v5922_v48  ;;  %v5995_v48 = vld [vmem:[#allocation14 + $0x26c] ss:$28 sps:$4 sm:$0xff]  }
 0x4e3   : > { %5409 = vmatprep.subr.bf16.mxu0 %v6593_v61 }
 0x4e6   : > { %5410 = vmatpush3.bf16.msra.mxu0 %v5926_v52  ;;  %v5996_v52 = vld [vmem:[#allocation14 + $0x270] ss:$28 sps:$4 sm:$0xff]  }
 0x4e7   : > { %4172 = vmatprep.subr.bf16.mxu0 %v5932_v54  ;;  %v6004_v54 = vld [vmem:[#allocation14 + $0x2ac] ss:$28 sps:$4 sm:$0xff]  }
 0x59c   : > { %v2713_v59 = vpop.f32.mrb[4].mxu0 }
 0x59d   : > { %v2714_v58 = vadd.f32 %v4970_v57, %v2713_v59  ;;  %v5393_v60 = vpop.f32.mrb[5].mxu0  ;;  %v6002_v59 = vld [vmem:[#allocation14 + $0x2a8] ss:$28 sps:$4 sm:$0xff]  }
 0x59e   : > { %v2716_v62 = vpop.f32.mrb[6].mxu0  ;;  %v6010_v60 = vld [vmem:[#allocation14 + $0x2e4] ss:$28 sps:$4 sm:$0xff]  }
 0x59f   : > { %v2717_v63 = vadd.f32 %v4970_v57, %v2716_v62  ;;  %v5394_v0 = vpop.f32.mrb[7].mxu0  ;;  %v2720_v1 = vmax.f32 %v2714_v58, 0.0  ;;  %v5999_v57 = vld [vmem:[#allocation14 + $0x2a0] ss:$28 sps:$4 sm:$0xff]   ;;  %v6005_v62 = vld [vmem:[#allocation14 + $0x2d8] ss:$28 sps:$4 sm:$0xff]  }
 0x5a0   : > { %v6007_v58 = vld [vmem:[#allocation14 + $0x2dc] ss:$28 sps:$4 sm:$0xff]   ;;  %v6013_v0 = vld [vmem:[#allocation14 + $0x314] ss:$28 sps:$4 sm:$0xff]  }
 0x5a1   : > { %v2721_v2 = vmax.f32 %v2717_v63, 0.0  ;;  %v6008_v63 = vld [vmem:[#allocation14 + $0x2e0] ss:$28 sps:$4 sm:$0xff]  }
 0x5a3   : > { %v2722_v5 = vpack.c.bf16 %v2721_v2, %v2720_v1  ;;  %v6016_v1 = vld [vmem:[#allocation14 + $0x31c] ss:$28 sps:$4 sm:$0xff]   ;;  %v6011_v2 = vld [vmem:[#allocation14 + $0x310] ss:$28 sps:$4 sm:$0xff]  }
 0x5a5   : > { %2933 = vmatmul.mubr.bf16.vlgmr.msra.gmra.mrb[28].mxu1 %v2722_v5  ;;  %5412 = vmatmul.mubr.bf16.vlgmr.msra.gmra.mrb[8].mxu0 %v2722_v5  ;;  %v6022_v5 = vld [vmem:[#allocation14 + $0x354] ss:$28 sps:$4 sm:$0xff]  }
 0x5a6   : > { %4087 = vmatpush1.bf16.msra.mxu1 %v5927_v3  ;;  %4173 = vmatpush1.bf16.msra.mxu0 %v5930_v4  ;;  %v6014_v3 = vld [vmem:[#allocation14 + $0x318] ss:$28 sps:$4 sm:$0xff]   ;;  %v6019_v4 = vld [vmem:[#allocation14 + $0x34c] ss:$28 sps:$4 sm:$0xff]  }
 0x5a7   : > { %4088 = vmatprep.subr.bf16.mxu1 %v5935_v6  ;;  %4174 = vmatprep.subr.bf16.mxu0 %v5938_v7  ;;  %v6017_v6 = vld [vmem:[#allocation14 + $0x348] ss:$28 sps:$4 sm:$0xff]   ;;  %v6020_v7 = vld [vmem:[#allocation14 + $0x350] ss:$28 sps:$4 sm:$0xff]  }
 0x5aa   : > { %4089 = vmatpush1.bf16.msra.mxu1 %v5933_v8  ;;  %4175 = vmatpush1.bf16.msra.mxu0 %v5936_v9  ;;  %v6025_v8 = vld [vmem:[#allocation14 + $0x384] ss:$28 sps:$4 sm:$0xff]   ;;  %v6028_v9 = vld [vmem:[#allocation14 + $0x38c] ss:$28 sps:$4 sm:$0xff]  }
 0x5ab   : > { %4090 = vmatprep.subr.bf16.mxu1 %v5941_v10  ;;  %4176 = vmatprep.subr.bf16.mxu0 %v5944_v11  ;;  %v2755_v10 = vld [vmem:[%s7362_s7] sm:$0x7] }
 0x5ac   : > { %v2760_v11 = vrot.slane %v2755_v10, %v7078_v55 }
 0x5ae   : > { %4091 = vmatpush1.bf16.msra.mxu1 %v5939_v12  ;;  %4177 = vmatpush1.bf16.msra.mxu0 %v5942_v13  ;;  %v2768_v12 = vrot.slane %v2755_v10, %v7070_v20  ;;  %v2764_v13 = vrot.slane %v2755_v10, %v7081_v56  ;;  %v6074_v10 = vld [vmem:[#allocation14 + $0x1d8] ss:$28 sps:$4 sm:$0xff]  }
 0x5af   : > { %4092 = vmatprep.subr.bf16.mxu1 %v5947_v14  ;;  %4178 = vmatprep.subr.bf16.mxu0 %v5950_v15 }
 0x5b2   : > { %4093 = vmatpush1.bf16.msra.mxu1 %v5945_v16  ;;  %4179 = vmatpush1.bf16.msra.mxu0 %v5948_v17 }
 0x5b3   : > { %4094 = vmatprep.subr.bf16.mxu1 %v5953_v18  ;;  %4180 = vmatprep.subr.bf16.mxu0 %v5956_v21 }
 0x5b6   : > { %4095 = vmatpush1.bf16.msra.mxu1 %v5951_v22  ;;  %4181 = vmatpush1.bf16.msra.mxu0 %v5954_v23 }
 0x5b7   : > { %4096 = vmatprep.subr.bf16.mxu1 %v5959_v24  ;;  %4182 = vmatprep.subr.bf16.mxu0 %v5962_v25 }
 0x5ba   : > { %4097 = vmatpush1.bf16.msra.mxu1 %v5957_v26  ;;  %4183 = vmatpush1.bf16.msra.mxu0 %v5960_v27 }
 0x5bb   : > { %4098 = vmatprep.subr.bf16.mxu1 %v5965_v28  ;;  %4184 = vmatprep.subr.bf16.mxu0 %v5968_v29 }
 0x5be   : > { %4099 = vmatpush1.bf16.msra.mxu1 %v5963_v30  ;;  %4185 = vmatpush1.bf16.msra.mxu0 %v5966_v31 }
 0x5bf   : > { %4100 = vmatprep.subr.bf16.mxu1 %v5971_v32  ;;  %4186 = vmatprep.subr.bf16.mxu0 %v5974_v33 }
 0x5c2   : > { %4101 = vmatpush1.bf16.msra.mxu1 %v5969_v34  ;;  %4187 = vmatpush1.bf16.msra.mxu0 %v5972_v35 }
 0x5c3   : > { %4102 = vmatprep.subr.bf16.mxu1 %v5977_v36  ;;  %4188 = vmatprep.subr.bf16.mxu0 %v5980_v37 }
 0x5c6   : > { %4103 = vmatpush1.bf16.msra.mxu1 %v5975_v38  ;;  %4189 = vmatpush1.bf16.msra.mxu0 %v5978_v39  ;;  %v6023_v39 = vld [vmem:[#allocation14 + $0x380] ss:$28 sps:$4 sm:$0xff]  }
 0x5c7   : > { %4104 = vmatprep.subr.bf16.mxu1 %v5983_v40  ;;  %4190 = vmatprep.subr.bf16.mxu0 %v5986_v41  ;;  %v6026_v40 = vld [vmem:[#allocation14 + $0x388] ss:$28 sps:$4 sm:$0xff]   ;;  %v6031_v41 = vld [vmem:[#allocation14 + $0x3bc] ss:$28 sps:$4 sm:$0xff]  }
 0x5ca   : > { %4105 = vmatpush1.bf16.msra.mxu1 %v5981_v42  ;;  %4191 = vmatpush1.bf16.msra.mxu0 %v5984_v43  ;;  %v6034_v42 = vld [vmem:[#allocation14 + $0x3c4] ss:$28 sps:$4 sm:$0xff]   ;;  %v6029_v43 = vld [vmem:[#allocation14 + $0x3b8] ss:$28 sps:$4 sm:$0xff]  }
 0x5cb   : > { %4106 = vmatprep.subr.bf16.mxu1 %v5989_v44  ;;  %4192 = vmatprep.subr.bf16.mxu0 %v5992_v45  ;;  %v6032_v44 = vld [vmem:[#allocation14 + $0x3c0] ss:$28 sps:$4 sm:$0xff]   ;;  %v6037_v45 = vld [vmem:[#allocation14 + $0x3f4] ss:$28 sps:$4 sm:$0xff]  }
 0x5ce   : > { %4107 = vmatpush1.bf16.msra.mxu1 %v5987_v46  ;;  %4193 = vmatpush1.bf16.msra.mxu0 %v5990_v47  ;;  %v6040_v46 = vld [vmem:[#allocation14 + $0x3fc] ss:$28 sps:$4 sm:$0xff]   ;;  %v6035_v47 = vld [vmem:[#allocation14 + $0x3f0] ss:$28 sps:$4 sm:$0xff]  }
 0x5cf   : > { %4108 = vmatprep.subr.bf16.mxu1 %v5995_v48  ;;  %4194 = vmatprep.subr.bf16.mxu0 %v5998_v49  ;;  %v6038_v48 = vld [vmem:[#allocation14 + $0x3f8] ss:$28 sps:$4 sm:$0xff]   ;;  %v6043_v49 = vld [vmem:[#allocation14 + $0x42c] ss:$28 sps:$4 sm:$0xff]  }
 0x5d2   : > { %4109 = vmatpush1.bf16.msra.mxu1 %v5993_v50  ;;  %4195 = vmatpush1.bf16.msra.mxu0 %v5996_v52  ;;  %v6046_v50 = vld [vmem:[#allocation14 + $0x434] ss:$28 sps:$4 sm:$0xff]   ;;  %v6041_v52 = vld [vmem:[#allocation14 + $0x428] ss:$28 sps:$4 sm:$0xff]  }
 0x5d3   : > { %4110 = vmatprep.subr.bf16.mxu1 %v6001_v53  ;;  %4196 = vmatprep.subr.bf16.mxu0 %v6004_v54  ;;  %v6044_v53 = vld [vmem:[#allocation14 + $0x430] ss:$28 sps:$4 sm:$0xff]   ;;  %v6049_v54 = vld [vmem:[#allocation14 + $0x464] ss:$28 sps:$4 sm:$0xff]  }
 0x5d6   : > { %4111 = vmatpush1.bf16.msra.mxu1 %v5999_v57  ;;  %4197 = vmatpush1.bf16.msra.mxu0 %v6002_v59  ;;  %v6052_v57 = vld [vmem:[#allocation14 + $0x46c] ss:$28 sps:$4 sm:$0xff]   ;;  %v6047_v59 = vld [vmem:[#allocation14 + $0x460] ss:$28 sps:$4 sm:$0xff]  }
 0x5d7   : > { %4112 = vmatprep.subr.bf16.mxu1 %v6007_v58  ;;  %4198 = vmatprep.subr.bf16.mxu0 %v6010_v60  ;;  %v6050_v58 = vld [vmem:[#allocation14 + $0x468] ss:$28 sps:$4 sm:$0xff]   ;;  %v6055_v60 = vld [vmem:[#allocation14 + $0x49c] ss:$28 sps:$4 sm:$0xff]  }
 0x5da   : > { %4113 = vmatpush1.bf16.msra.mxu1 %v6005_v62  ;;  %4199 = vmatpush1.bf16.msra.mxu0 %v6008_v63  ;;  %v6058_v62 = vld [vmem:[#allocation14 + $0x4a4] ss:$28 sps:$4 sm:$0xff]   ;;  %v6053_v63 = vld [vmem:[#allocation14 + $0x498] ss:$28 sps:$4 sm:$0xff]  }
 0x5db   : > { %4114 = vmatprep.subr.bf16.mxu1 %v6013_v0  ;;  %4200 = vmatprep.subr.bf16.mxu0 %v6016_v1  ;;  %v6056_v0 = vld [vmem:[#allocation14 + $0x4a0] ss:$28 sps:$4 sm:$0xff]   ;;  %v6061_v1 = vld [vmem:[#allocation14 + $0x4d4] ss:$28 sps:$4 sm:$0xff]  }
 0x5de   : > { %4115 = vmatpush1.bf16.msra.mxu1 %v6011_v2  ;;  %4201 = vmatpush1.bf16.msra.mxu0 %v6014_v3  ;;  %v6064_v2 = vld [vmem:[#allocation14 + $0x4dc] ss:$28 sps:$4 sm:$0xff]   ;;  %v6059_v3 = vld [vmem:[#allocation14 + $0x4d0] ss:$28 sps:$4 sm:$0xff]  }
 0x5df   : > { %4116 = vmatprep.subr.bf16.mxu1 %v6019_v4  ;;  %4202 = vmatprep.subr.bf16.mxu0 %v6022_v5  ;;  %v6062_v4 = vld [vmem:[#allocation14 + $0x4d8] ss:$28 sps:$4 sm:$0xff]   ;;  %v6067_v5 = vld [vmem:[#allocation14 + $0x50c] ss:$28 sps:$4 sm:$0xff]  }
 0x5e2   : > { %4117 = vmatpush1.bf16.msra.mxu1 %v6017_v6  ;;  %4203 = vmatpush1.bf16.msra.mxu0 %v6020_v7  ;;  %v6070_v6 = vld [vmem:[#allocation14 + $0x514] ss:$28 sps:$4 sm:$0xff]   ;;  %v6065_v7 = vld [vmem:[#allocation14 + $0x508] ss:$28 sps:$4 sm:$0xff]  }
 0x5e3   : > { %4129 = vmatprep.subr.bf16.mxu1 %v6025_v8  ;;  %4215 = vmatprep.subr.bf16.mxu0 %v6028_v9  ;;  %v6068_v8 = vld [vmem:[#allocation14 + $0x510] ss:$28 sps:$4 sm:$0xff]  }
 0x5e4   : > { %v6073_v9 = vld [vmem:[#allocation14 + $0x14] ss:$28 sps:$4 sm:$0xff]  }
 0x678   : > { %v2934_v14 = vpop.f32.mrb[28].mxu1  ;;  %v2977_v15 = vpop.f32.mrb[8].mxu0 }
 0x679   : > { %v2935_v16 = vadd.f32 %v2934_v14, %v2760_v11  ;;  %v2978_v17 = vadd.f32 %v2977_v15, %v2768_v12  ;;  %v2936_v18 = vpop.f32.mrb[29].mxu1  ;;  %v5413_v21 = vpop.f32.mrb[9].mxu0  ;;  %v6079_v14 = vld [vmem:[#allocation14 + $0x210] ss:$28 sps:$4 sm:$0xff]   ;;  %v6076_v15 = vld [vmem:[#allocation14 + $0x48] ss:$28 sps:$4 sm:$0xff]  }
 0x67a   : > { %v2937_v22 = vadd.f32 %v2936_v18, %v2764_v13  ;;  %v2938_v23 = vpop.f32.mrb[30].mxu1  ;;  %v2980_v24 = vpop.f32.mrb[10].mxu0  ;;  %v6084_v18 = vld [vmem:[#allocation14 + $0x248] ss:$28 sps:$4 sm:$0xff]   ;;  %v6081_v21 = vld [vmem:[#allocation14 + $0x80] ss:$28 sps:$4 sm:$0xff]  }
 0x67b   : > { %v2939_v25 = vadd.f32 %v2938_v23, %v2760_v11  ;;  %v2981_v26 = vadd.f32 %v2980_v24, %v2768_v12  ;;  %v2940_v27 = vpop.f32.mrb[31].mxu1  ;;  %v5414_v28 = vpop.f32.mrb[11].mxu0  ;;  %v2984_v30 = vmax.f32 %v2935_v16, 0.0  ;;  %v2986_v31 = vmax.f32 %v2978_v17, 0.0  ;;  %v6071_v11 = vld [vmem:[#allocation14 + $0x10] ss:$28 sps:$4 sm:$0xff]  }
 0x67c   : > { %v2941_v29 = vadd.f32 %v2940_v27, %v2764_v13  ;;  %v2985_v34 = vmax.f32 %v2937_v22, 0.0  ;;  %v6075_v12 = vld [vmem:[#allocation14 + $0x18] ss:$28 sps:$4 sm:$0xff]   ;;  %v6078_v13 = vld [vmem:[#allocation14 + $0x4c] ss:$28 sps:$4 sm:$0xff]  }
 0x67d   : > { %v2987_v32 = vmax.f32 %v2939_v25, 0.0  ;;  %v2989_v33 = vmax.f32 %v2981_v26, 0.0  ;;  %v6080_v16 = vld [vmem:[#allocation14 + $0x50] ss:$28 sps:$4 sm:$0xff]   ;;  %v6083_v17 = vld [vmem:[#allocation14 + $0x84] ss:$28 sps:$4 sm:$0xff]  }
 0x67e   : > { %v2988_v35 = vmax.f32 %v2941_v29, 0.0  ;;  %v6085_v22 = vld [vmem:[#allocation14 + $0x88] ss:$28 sps:$4 sm:$0xff]   ;;  %v6088_v23 = vld [vmem:[#allocation14 + $0xbc] ss:$28 sps:$4 sm:$0xff]  }
 0x67f   : > { %v7141_v36 = vpack.c.bf16 %v2987_v32, %v2984_v30  ;;  %v7143_v37 = vpack.c.bf16 %v2989_v33, %v2986_v31  ;;  %v6089_v24 = vld [vmem:[#allocation14 + $0x280] ss:$28 sps:$4 sm:$0xff]   ;;  %v6086_v25 = vld [vmem:[#allocation14 + $0xb8] ss:$28 sps:$4 sm:$0xff]   ;;  %v6091_v29 = vld [vmem:[#allocation14 + $0xf0] ss:$28 sps:$4 sm:$0xff]  }
 0x680   : > { %v7145_v38 = vpack.c.bf16 %v2988_v35, %v2985_v34  ;;  %v6090_v26 = vld [vmem:[#allocation14 + $0xc0] ss:$28 sps:$4 sm:$0xff]   ;;  %v6093_v27 = vld [vmem:[#allocation14 + $0xf4] ss:$28 sps:$4 sm:$0xff]   ;;  %v6098_v31 = vld [vmem:[#allocation14 + $0x12c] ss:$28 sps:$4 sm:$0xff]  }
 0x681   : > { %v6094_v28 = vld [vmem:[#allocation14 + $0x2b8] ss:$28 sps:$4 sm:$0xff]   ;;  %v6099_v32 = vld [vmem:[#allocation14 + $0x2f0] ss:$28 sps:$4 sm:$0xff]   ;;  %v6096_v33 = vld [vmem:[#allocation14 + $0x128] ss:$28 sps:$4 sm:$0xff]  }
 0x682   : > { %4118 = vmatprep.mubr.bf16.mxu1 %v7145_v38  ;;  %4204 = vmatprep.mubr.bf16.mxu0 %v7145_v38  ;;  %v6095_v30 = vld [vmem:[#allocation14 + $0xf8] ss:$28 sps:$4 sm:$0xff]   ;;  %v6100_v34 = vld [vmem:[#allocation14 + $0x130] ss:$28 sps:$4 sm:$0xff]   ;;  %v6103_v35 = vld [vmem:[#allocation14 + $0x164] ss:$28 sps:$4 sm:$0xff]  }
 0x683   : > { %4119 = vmatmul.mubr.bf16.vlgmr.msra.gmra.mrb[32].mxu1 %v7141_v36  ;;  %4205 = vmatmul.mubr.bf16.vlgmr.msra.gmra.mrb[12].mxu0 %v7141_v36 }
 0x684   : > { %4130 = vmatpush1.bf16.msra.mxu1 %v6023_v39  ;;  %4216 = vmatpush1.bf16.msra.mxu0 %v6026_v40  ;;  %v6101_v39 = vld [vmem:[#allocation14 + $0x160] ss:$28 sps:$4 sm:$0xff]   ;;  %v6105_v40 = vld [vmem:[#allocation14 + $0x168] ss:$28 sps:$4 sm:$0xff]  }
 0x685   : > { %4131 = vmatprep.subr.bf16.mxu1 %v6031_v41  ;;  %4217 = vmatprep.subr.bf16.mxu0 %v6034_v42  ;;  %v6108_v41 = vld [vmem:[#allocation14 + $0x19c] ss:$28 sps:$4 sm:$0xff]  }
 0x686   : > { %4161 = vmatprep.mubr.bf16.mxu1 %v6595_v51  ;;  %4247 = vmatprep.mubr.bf16.mxu0 %v6595_v51  ;;  %v6109_v42 = vld [vmem:[#allocation14 + $0x360] ss:$28 sps:$4 sm:$0xff]  }
 0x688   : > { %4132 = vmatpush1.bf16.msra.mxu1 %v6029_v43  ;;  %4218 = vmatpush1.bf16.msra.mxu0 %v6032_v44  ;;  %v6106_v43 = vld [vmem:[#allocation14 + $0x198] ss:$28 sps:$4 sm:$0xff]   ;;  %v6110_v44 = vld [vmem:[#allocation14 + $0x1a0] ss:$28 sps:$4 sm:$0xff]  }
 0x689   : > { %4133 = vmatprep.subr.bf16.mxu1 %v6037_v45  ;;  %4219 = vmatprep.subr.bf16.mxu0 %v6040_v46  ;;  %v6113_v45 = vld [vmem:[#allocation14 + $0x1d4] ss:$28 sps:$4 sm:$0xff]  }
 0x68a   : > { %v6111_v46 = vld [vmem:[#allocation14 + $0x1d0] ss:$28 sps:$4 sm:$0xff]  }
 0x68c   : > { %4134 = vmatpush1.bf16.msra.mxu1 %v6035_v47  ;;  %4220 = vmatpush1.bf16.msra.mxu0 %v6038_v48  ;;  %v6114_v47 = vld [vmem:[#allocation14 + $0x398] ss:$28 sps:$4 sm:$0xff]   ;;  %v6117_v48 = vld [vmem:[#allocation14 + $0x20c] ss:$28 sps:$4 sm:$0xff]  }
 0x68d   : > { %4135 = vmatprep.subr.bf16.mxu1 %v6043_v49  ;;  %4221 = vmatprep.subr.bf16.mxu0 %v6046_v50  ;;  %v6115_v49 = vld [vmem:[#allocation14 + $0x208] ss:$28 sps:$4 sm:$0xff]   ;;  %v6118_v50 = vld [vmem:[#allocation14 + $0x3d0] ss:$28 sps:$4 sm:$0xff]  }
 0x690   : > { %4136 = vmatpush1.bf16.msra.mxu1 %v6041_v52  ;;  %4222 = vmatpush1.bf16.msra.mxu0 %v6044_v53  ;;  %v6121_v52 = vld [vmem:[#allocation14 + $0x244] ss:$28 sps:$4 sm:$0xff]  }
 0x691   : > { %4137 = vmatprep.subr.bf16.mxu1 %v6049_v54  ;;  %4223 = vmatprep.subr.bf16.mxu0 %v6052_v57  ;;  %v6119_v53 = vld [vmem:[#allocation14 + $0x240] ss:$28 sps:$4 sm:$0xff]   ;;  %v6122_v54 = vld [vmem:[#allocation14 + $0x408] ss:$28 sps:$4 sm:$0xff]  }
 0x692   : > { %v6125_v57 = vld [vmem:[#allocation14 + $0x27c] ss:$28 sps:$4 sm:$0xff]  }
 0x694   : > { %4138 = vmatpush1.bf16.msra.mxu1 %v6047_v59  ;;  %4224 = vmatpush1.bf16.msra.mxu0 %v6050_v58  ;;  %v6123_v59 = vld [vmem:[#allocation14 + $0x278] ss:$28 sps:$4 sm:$0xff]   ;;  %v6126_v58 = vld [vmem:[#allocation14 + $0x440] ss:$28 sps:$4 sm:$0xff]  }
 0x695   : > { %4139 = vmatprep.subr.bf16.mxu1 %v6055_v60  ;;  %4225 = vmatprep.subr.bf16.mxu0 %v6058_v62  ;;  %v6129_v60 = vld [vmem:[#allocation14 + $0x2b4] ss:$28 sps:$4 sm:$0xff]  }
 0x696   : > { %v6127_v62 = vld [vmem:[#allocation14 + $0x2b0] ss:$28 sps:$4 sm:$0xff]  }
 0x698   : > { %4140 = vmatpush1.bf16.msra.mxu1 %v6053_v63  ;;  %4226 = vmatpush1.bf16.msra.mxu0 %v6056_v0  ;;  %v6130_v63 = vld [vmem:[#allocation14 + $0x478] ss:$28 sps:$4 sm:$0xff]   ;;  %v6133_v0 = vld [vmem:[#allocation14 + $0x2ec] ss:$28 sps:$4 sm:$0xff]  }
 0x699   : > { %4141 = vmatprep.subr.bf16.mxu1 %v6061_v1  ;;  %4227 = vmatprep.subr.bf16.mxu0 %v6064_v2  ;;  %v6131_v1 = vld [vmem:[#allocation14 + $0x2e8] ss:$28 sps:$4 sm:$0xff]   ;;  %v6134_v2 = vld [vmem:[#allocation14 + $0x4b0] ss:$28 sps:$4 sm:$0xff]  }
 0x69c   : > { %4142 = vmatpush1.bf16.msra.mxu1 %v6059_v3  ;;  %4228 = vmatpush1.bf16.msra.mxu0 %v6062_v4  ;;  %v6137_v3 = vld [vmem:[#allocation14 + $0x324] ss:$28 sps:$4 sm:$0xff]  }
 0x69d   : > { %4143 = vmatprep.subr.bf16.mxu1 %v6067_v5  ;;  %4229 = vmatprep.subr.bf16.mxu0 %v6070_v6  ;;  %v6135_v4 = vld [vmem:[#allocation14 + $0x320] ss:$28 sps:$4 sm:$0xff]   ;;  %v6138_v5 = vld [vmem:[#allocation14 + $0x4e8] ss:$28 sps:$4 sm:$0xff]  }
 0x69e   : > { %v6141_v6 = vld [vmem:[#allocation14 + $0x35c] ss:$28 sps:$4 sm:$0xff]  }
 0x6a0   : > { %4144 = vmatpush1.bf16.msra.mxu1 %v6065_v7  ;;  %4230 = vmatpush1.bf16.msra.mxu0 %v6068_v8  ;;  %v6139_v7 = vld [vmem:[#allocation14 + $0x358] ss:$28 sps:$4 sm:$0xff]   ;;  %v6142_v8 = vld [vmem:[#allocation14 + $0x520] ss:$28 sps:$4 sm:$0xff]  }
 0x6a1   : > { %4258 = vmatprep.subr.bf16.mxu1 %v6073_v9  ;;  %5304 = vmatprep.subr.bf16.mxu0 %v6074_v10  ;;  %v6145_v9 = vld [vmem:[#allocation14 + $0x394] ss:$28 sps:$4 sm:$0xff]  }
 0x6a2   : > { %v6143_v10 = vld [vmem:[#allocation14 + $0x390] ss:$28 sps:$4 sm:$0xff]  }
 0x6a3   : > { %4162 = vmatmul.mubr.bf16.vlgmr.msra.gmra.mrb[32].mxu1 %v7143_v37  ;;  %4248 = vmatmul.mubr.bf16.vlgmr.msra.gmra.mrb[12].mxu0 %v7143_v37 }
 0x6a4   : > { %4259 = vmatpush1.bf16.msra.mxu1 %v6071_v11  ;;  %4290 = vmatprep.mubr.bf16.mxu1 %v7145_v38  ;;  %v6148_v11 = vld [vmem:[#allocation14 + $0x3cc] ss:$28 sps:$4 sm:$0xff]  }
 0x6a5   : > { %5305 = vmatpush3.bf16.msra.mxu0 %v6075_v12  ;;  %4376 = vmatprep.mubr.bf16.mxu0 %v7145_v38  ;;  %v6104_v38 = vld [vmem:[#allocation14 + $0x328] ss:$28 sps:$4 sm:$0xff]  }
 0x6a6   : > { %4260 = vmatprep.subr.bf16.mxu1 %v6078_v13  ;;  %5306 = vmatprep.subr.bf16.mxu0 %v6079_v14  ;;  %v6146_v12 = vld [vmem:[#allocation14 + $0x3c8] ss:$28 sps:$4 sm:$0xff]   ;;  %v6149_v14 = vld [vmem:[#allocation14 + $0x400] ss:$28 sps:$4 sm:$0xff]  }
 0x6a7   : > { %v6151_v13 = vld [vmem:[#allocation14 + $0x404] ss:$28 sps:$4 sm:$0xff]  }
 0x6a8   : > { %4261 = vmatpush1.bf16.msra.mxu1 %v6076_v15  ;;  %v6154_v15 = vld [vmem:[#allocation14 + $0x43c] ss:$28 sps:$4 sm:$0xff]  }
 0x6a9   : > { %5307 = vmatpush3.bf16.msra.mxu0 %v6080_v16  ;;  %4262 = vmatprep.subr.bf16.mxu1 %v6083_v17  ;;  %v6157_v16 = vld [vmem:[#allocation14 + $0x474] ss:$28 sps:$4 sm:$0xff]  }
 0x6aa   : > { %5308 = vmatprep.subr.bf16.mxu0 %v6084_v18  ;;  %v6155_v17 = vld [vmem:[#allocation14 + $0x470] ss:$28 sps:$4 sm:$0xff]   ;;  %v6158_v18 = vld [vmem:[#allocation14 + $0x4a8] ss:$28 sps:$4 sm:$0xff]  }
 0x6ac   : > { %4263 = vmatpush1.bf16.msra.mxu1 %v6081_v21  ;;  %v6163_v21 = vld [vmem:[#allocation14 + $0x4e4] ss:$28 sps:$4 sm:$0xff]  }
 0x6ad   : > { %5309 = vmatpush3.bf16.msra.mxu0 %v6085_v22  ;;  %4264 = vmatprep.subr.bf16.mxu1 %v6088_v23  ;;  %v6161_v22 = vld [vmem:[#allocation14 + $0x4e0] ss:$28 sps:$4 sm:$0xff]   ;;  %v6164_v23 = vld [vmem:[#allocation14 + $0x518] ss:$28 sps:$4 sm:$0xff]  }
 0x6ae   : > { %5310 = vmatprep.subr.bf16.mxu0 %v6089_v24  ;;  %v7175_v24 = vld [vmem:[%s7363_s22] sm:$0xff] }
 0x6b0   : > { %4265 = vmatpush1.bf16.msra.mxu1 %v6086_v25  ;;  %v3201_v25 = vsub.s32 3, %v7067_v19 }
 0x6b1   : > { %5311 = vmatpush3.bf16.msra.mxu0 %v6090_v26  ;;  %4266 = vmatprep.subr.bf16.mxu1 %v6093_v27  ;;  %v3190_v26 = vrot.slane %v7175_v24, %v7078_v55  ;;  %v3198_v27 = vrot.slane %v7175_v24, %v7070_v20 }
 0x6b2   : > { %5312 = vmatprep.subr.bf16.mxu0 %v6094_v28  ;;  %v3194_v28 = vrot.slane %v7175_v24, %v7081_v56 }
 0x6b4   : > { %4267 = vmatpush1.bf16.msra.mxu1 %v6091_v29  ;;  %v3202_v29 = vrot.slane %v7175_v24, %v3201_v25 }
 0x6b5   : > { %5313 = vmatpush3.bf16.msra.mxu0 %v6095_v30  ;;  %4268 = vmatprep.subr.bf16.mxu1 %v6098_v31 }
 0x6b6   : > { %5314 = vmatprep.subr.bf16.mxu0 %v6099_v32 }
 0x6b8   : > { %4269 = vmatpush1.bf16.msra.mxu1 %v6096_v33 }
 0x6b9   : > { %5315 = vmatpush3.bf16.msra.mxu0 %v6100_v34  ;;  %4270 = vmatprep.subr.bf16.mxu1 %v6103_v35 }
 0x6ba   : > { %5316 = vmatprep.subr.bf16.mxu0 %v6104_v38 }
 0x6bc   : > { %4271 = vmatpush1.bf16.msra.mxu1 %v6101_v39 }
 0x6bd   : > { %5317 = vmatpush3.bf16.msra.mxu0 %v6105_v40  ;;  %4272 = vmatprep.subr.bf16.mxu1 %v6108_v41 }
 0x6be   : > { %5318 = vmatprep.subr.bf16.mxu0 %v6109_v42 }
 0x6c0   : > { %4273 = vmatpush1.bf16.msra.mxu1 %v6106_v43 }
 0x6c1   : > { %5319 = vmatpush3.bf16.msra.mxu0 %v6110_v44  ;;  %4274 = vmatprep.subr.bf16.mxu1 %v6113_v45 }
 0x6c2   : > { %5415 = vmatprep.subr.bf16.mxu0 %v6593_v61 }
 0x6c4   : > { %4377 = vmatmul.mubr.bf16.vlgmr.msra.gmra.mrb[16].mxu0 %v7141_v36  ;;  %4275 = vmatpush1.bf16.msra.mxu1 %v6111_v46 }
 0x6c5   : > { %5416 = vmatpush3.bf16.msra.mxu0 %v6114_v47  ;;  %4276 = vmatprep.subr.bf16.mxu1 %v6117_v48 }
 0x6c6   : > { %5417 = vmatprep.subr.bf16.mxu0 %v6593_v61  ;;  %5431 = vmatprep.mubr.msk.bf16.mxu0 %vm6594_vm0, %v6593_v61 }
 0x6c8   : > { %4277 = vmatpush1.bf16.msra.mxu1 %v6115_v49 }
 0x6c9   : > { %5418 = vmatpush3.bf16.msra.mxu0 %v6118_v50  ;;  %4278 = vmatprep.subr.bf16.mxu1 %v6121_v52 }
 0x6ca   : > { %5419 = vmatprep.subr.bf16.mxu0 %v6593_v61 }
 0x6cc   : > { %4279 = vmatpush1.bf16.msra.mxu1 %v6119_v53 }
 0x6cd   : > { %5420 = vmatpush3.bf16.msra.mxu0 %v6122_v54  ;;  %4280 = vmatprep.subr.bf16.mxu1 %v6125_v57 }
 0x6ce   : > { %5421 = vmatprep.subr.bf16.mxu0 %v6593_v61 }
 0x6d0   : > { %4281 = vmatpush1.bf16.msra.mxu1 %v6123_v59 }
 0x6d1   : > { %5422 = vmatpush3.bf16.msra.mxu0 %v6126_v58  ;;  %4282 = vmatprep.subr.bf16.mxu1 %v6129_v60 }
 0x6d2   : > { %5423 = vmatprep.subr.bf16.mxu0 %v6593_v61 }
 0x6d4   : > { %4283 = vmatpush1.bf16.msra.mxu1 %v6127_v62 }
 0x6d5   : > { %5424 = vmatpush3.bf16.msra.mxu0 %v6130_v63  ;;  %4284 = vmatprep.subr.bf16.mxu1 %v6133_v0 }
 0x6d6   : > { %5425 = vmatprep.subr.bf16.mxu0 %v6593_v61 }
 0x6d8   : > { %4285 = vmatpush1.bf16.msra.mxu1 %v6131_v1 }
 0x6d9   : > { %5426 = vmatpush3.bf16.msra.mxu0 %v6134_v2  ;;  %4286 = vmatprep.subr.bf16.mxu1 %v6137_v3 }
 0x6da   : > { %5427 = vmatprep.subr.bf16.mxu0 %v6593_v61 }
 0x6dc   : > { %4287 = vmatpush1.bf16.msra.mxu1 %v6135_v4 }
 0x6dd   : > { %5428 = vmatpush3.bf16.msra.mxu0 %v6138_v5  ;;  %4288 = vmatprep.subr.bf16.mxu1 %v6141_v6 }
 0x6de   : > { %5429 = vmatprep.subr.bf16.mxu0 %v6593_v61  ;;  %v6152_v61 = vld [vmem:[#allocation14 + $0x438] ss:$28 sps:$4 sm:$0xff]  }
 0x6e0   : > { %4289 = vmatpush1.bf16.msra.mxu1 %v6139_v7 }
 0x6e1   : > { %5430 = vmatpush3.bf16.msra.mxu0 %v6142_v8  ;;  %4301 = vmatprep.subr.bf16.mxu1 %v6145_v9 }
 0x6e3   : > { %4291 = vmatmul.mubr.bf16.vlgmr.msra.gmra.mrb[36].mxu1 %v7141_v36  ;;  %v6160_v36 = vld [vmem:[#allocation14 + $0x4ac] ss:$28 sps:$4 sm:$0xff]  }
 0x6e4   : > { %5432 = vmatmul.mubr.bf16.vlgmr.msra.gmra.mrb[20].mxu0 %v7143_v37  ;;  %4302 = vmatpush1.bf16.msra.mxu1 %v6143_v10 }
 0x6e5   : > { %4303 = vmatprep.subr.bf16.mxu1 %v6148_v11  ;;  %4333 = vmatprep.mubr.bf16.mxu1 %v6595_v51  ;;  %v6166_v51 = vld [vmem:[#allocation14 + $0x51c] ss:$28 sps:$4 sm:$0xff]  }
 0x6e8   : > { %4304 = vmatpush1.bf16.msra.mxu1 %v6146_v12 }
 0x6e9   : > { %4305 = vmatprep.subr.bf16.mxu1 %v6151_v13 }
 0x6ec   : > { %4306 = vmatpush1.bf16.msra.mxu1 %v6149_v14 }
 0x6ed   : > { %4307 = vmatprep.subr.bf16.mxu1 %v6154_v15 }
 0x6f0   : > { %4308 = vmatpush1.bf16.msra.mxu1 %v6152_v61 }
 0x6f1   : > { %4309 = vmatprep.subr.bf16.mxu1 %v6157_v16 }
 0x6f4   : > { %4310 = vmatpush1.bf16.msra.mxu1 %v6155_v17 }
 0x6f5   : > { %4311 = vmatprep.subr.bf16.mxu1 %v6160_v36 }
 0x6f8   : > { %4312 = vmatpush1.bf16.msra.mxu1 %v6158_v18 }
 0x6f9   : > { %4313 = vmatprep.subr.bf16.mxu1 %v6163_v21 }
 0x6fc   : > { %4314 = vmatpush1.bf16.msra.mxu1 %v6161_v22 }
 0x6fd   : > { %4315 = vmatprep.subr.bf16.mxu1 %v6166_v51 }
 0x700   : > { %4316 = vmatpush1.bf16.msra.mxu1 %v6164_v23 }
 0x703   : > { %4334 = vmatmul.mubr.bf16.vlgmr.msra.gmra.mrb[36].mxu1 %v7143_v37 }
 0x776   : > { %v4163_v30 = vpop.f32.mrb[32].mxu1  ;;  %v4249_v37 = vpop.f32.mrb[12].mxu0 }
 0x777   : > { %v5439_v31 = vadd.f32 %v4163_v30, %v3190_v26  ;;  %v5443_v32 = vadd.f32 %v4249_v37, %v3198_v27  ;;  %v4165_v33 = vpop.f32.mrb[33].mxu1  ;;  %v4251_v34 = vpop.f32.mrb[13].mxu0 }
 0x778   : > { %v5440_v35 = vadd.f32 %v4165_v33, %v3194_v28  ;;  %v5444_v38 = vadd.f32 %v4251_v34, %v3202_v29  ;;  %v4167_v39 = vpop.f32.mrb[34].mxu1  ;;  %v4253_v40 = vpop.f32.mrb[14].mxu0 }
 0x779   : > { %v4426_v55 = vsub.f32 0.0, %v5439_v31  ;;  %v4428_v41 = vsub.f32 0.0, %v5443_v32  ;;  %v5441_v42 = vadd.f32 %v4167_v39, %v3190_v26  ;;  %v5445_v20 = vadd.f32 %v4253_v40, %v3198_v27  ;;  %v4169_v43 = vpop.f32.mrb[35].mxu1  ;;  %v4255_v44 = vpop.f32.mrb[15].mxu0 }
 0x77a   : > { %v4427_v56 = vsub.f32 0.0, %v5440_v35  ;;  %v4429_v45 = vsub.f32 0.0, %v5444_v38  ;;  %v5442_v46 = vadd.f32 %v4169_v43, %v3194_v28  ;;  %v5446_v47 = vadd.f32 %v4255_v44, %v3202_v29 }
 0x77b   : > { %v4440_v48 = vmul.f32 1.442695, %v4426_v55  ;;  %v4444_v49 = vmul.f32 1.442695, %v4428_v41  ;;  %v4433_v50 = vsub.f32 0.0, %v5441_v42  ;;  %v4435_v52 = vsub.f32 0.0, %v5445_v20 }
 0x77c   : > { %v4442_v53 = vmul.f32 1.442695, %v4427_v56  ;;  %v4446_v54 = vmul.f32 1.442695, %v4429_v45  ;;  %v4434_v57 = vsub.f32 0.0, %v5442_v46  ;;  %v4436_v59 = vsub.f32 0.0, %v5446_v47 }
 0x77d   : > { %6171 = vpow2.f32 %v4440_v48  ;;  %v4454_v58 = vmul.f32 1.442695, %v4433_v50  ;;  %v4458_v60 = vmul.f32 1.442695, %v4435_v52 }
 0x77e   : > { %6173 = vpow2.f32 %v4444_v49  ;;  %v4456_v62 = vmul.f32 1.442695, %v4434_v57  ;;  %v4460_v63 = vmul.f32 1.442695, %v4436_v59 }
 0x77f   : > { %6175 = vpow2.f32 %v4442_v53 }
 0x780   : > { %6177 = vpow2.f32 %v4446_v54 }
 0x781   : > { %6179 = vpow2.f32 %v4454_v58 }
 0x782   : > { %6468 = shalt.err (!%p6465_p1)
}
 0x783   : > { %s6469_s8 = scalar_lea.hbm %s7192_s26, 768  ;;  %s6473_s15 = scalar_lea.hbm %s7364_s6, 1536 }
 0x784   : > { %p6470_p10 = scmp.ne.s32.totalorder %s7192_s26, %s6469_s8  ;;  %p6474_p12 = scmp.lt.u32.totalorder %s7192_s26, %s7364_s6 }
 0x785   : > { %p6475_p0 = scmp.lt.u32.totalorder %s6473_s15, %s6469_s8  ;;  %p6477_p7 = scmp.lt.u32.totalorder %s6469_s8, %s7192_s26 }
 0x786   : > { %p6471_p11 = pnand %p6470_p10, %p7365_p9 }
 0x787   : > { %p6476_p13 = por %p6475_p0, %p6474_p12 }
 0x788   : > { %p6472_p3 = pneg %p6471_p11 }
 0x789   : > { %p6478_p6 = por %p6477_p7, %p6476_p13 }
 0x78b   : > { %p6479_p2 = pnand %p6478_p6, %p6472_p3 }
 0x78d   : > { %6482 = shalt.err (!%p6479_p2)
}
 0x78e   : > { %s6597_s23 = smov 384   ;;  %s6598_s2 = smov 24   ;;  %6181 = vpow2.f32 %v4458_v60  ;;  %v6172_v0 = vpop.eup %6171  ;;  %v3213_v30 = vsub.s32 6, %v7067_v19  ;;  %v3205_v46 = vsub.s32 4, %v7067_v19  ;;  %v3209_v47 = vsub.s32 5, %v7067_v19 }
 0x78f   : > { %5510 = dma.vmem_to_hbm [thread:$0]  (%p7365_p9), %s7186_s17, 768, %s7192_s26, %s4522_s9, %s6597_s23, %s6597_s23, %s6598_s2   ;;  %6183 = vpow2.f32 %v4456_v62  ;;  %v6174_v1 = vpop.eup %6173  ;;  %v4468_v2 = vadd.f32 1.0, %v6172_v0 }
 0x790   : > { %6185 = vpow2.f32 %v4460_v63  ;;  %v6176_v3 = vpop.eup %6175  ;;  %v4470_v4 = vadd.f32 1.0, %v6174_v1  ;;  %s7220_s17 = scalar_lea.vmem [#allocation16], %s5477_s4  ;;  %v3214_v37 = vrot.slane %v7175_v24, %v3213_v30  ;;  %v3206_v48 = vrot.slane %v7175_v24, %v3205_v46  ;;  %s5479_s4 = smul.u32 1792, %s6703_s24 }
 0x791   : > { %v6178_v5 = vpop.eup %6177  ;;  %6187 = vrcp.f32 %v4468_v2  ;;  %v4469_v6 = vadd.f32 1.0, %v6176_v3  ;;  %v3210_v49 = vrot.slane %v7175_v24, %v3209_v47  ;;  %s4536_s0 = sshll.u32 %s7220_s17, 4  ;;  %s7366_s10 = sld [smem:[#allocation38_spill]]  ;;  %s7247_s0 = int_to_ptr.vmem [resolvable:$true] %s4536_s0 }
 0x792   : > { %v6180_v7 = vpop.eup %6179  ;;  %6189 = vrcp.f32 %v4470_v4  ;;  %v4471_v8 = vadd.f32 1.0, %v6178_v5  ;;  %s4517_s24 = scalar_lea.sflag [#allocation4], %s6987_s27  ;;  %s6483_s5 = scalar_lea.vmem %s7247_s0, 1792 }
 0x793   : > { %6191 = vrcp.f32 %v4469_v6  ;;  %v4475_v10 = vadd.f32 1.0, %v6180_v7  ;;  %p6484_p5 = scmp.ne.s32.totalorder %s7247_s0, %s6483_s5  ;;  %s6599_s11 = smov [#allocation16]  }
 0x794   : > { %6193 = vrcp.f32 %v4471_v8  ;;  %s6487_s8 = sshll.u32 %s6599_s11, 4  ;;  %s6488_s8 = int_to_ptr.vmem [resolvable:$false] %s6487_s8 }
 0x795   : > { %6195 = vrcp.f32 %v4475_v10  ;;  %p6485_p8 = pnand %p6484_p5, %p7365_p9  ;;  %s6489_s25 = scalar_lea.vmem %s6488_s8, 3584 }
 0x796   : > { %p6490_p1 = scmp.lt.s32.totalorder %s7247_s0, %s6488_s8  ;;  %p6491_p10 = scmp.lt.s32.totalorder %s6489_s25, %s6483_s5 }
 0x797   : > { %v5320_v18 = vpop.f32.mrb[16].mxu0  ;;  %s7244_s29 = scalar_lea.hbm %s7366_s10, %s5479_s4  ;;  %p6486_p4 = pneg %p6485_p8 }
 0x798   : > { %v6182_v9 = vpop.eup %6181  ;;  %v5321_v22 = vpop.f32.mrb[17].mxu0  ;;  %p6492_p11 = por %p6491_p10, %p6490_p1 }
 0x799   : > { %v6184_v11 = vpop.eup %6183  ;;  %v4477_v12 = vadd.f32 1.0, %v6182_v9  ;;  %v5322_v23 = vadd.f32 %v5321_v22, %v5320_v18  ;;  %v5323_v25 = vpop.f32.mrb[18].mxu0 }
 0x79a   : > { %v6186_v13 = vpop.eup %6185  ;;  %v4476_v14 = vadd.f32 1.0, %v6184_v11  ;;  %v5324_v27 = vpop.f32.mrb[19].mxu0  ;;  %p6493_p3 = pnand %p6492_p11, %p6486_p4 }
 0x79b   : > { %6197 = vrcp.f32 %v4477_v12  ;;  %v4478_v15 = vadd.f32 1.0, %v6186_v13  ;;  %v6188_v61 = vpop.eup %6187  ;;  %v5325_v29 = vadd.f32 %v5324_v27, %v5323_v25  ;;  %v4379_v31 = vadd.f32 %v5322_v23, %v3214_v37 }
 0x79c   : > { %6199 = vrcp.f32 %v4476_v14  ;;  %v6190_v16 = vpop.eup %6189  ;;  %4496 = vst [vmem:[%s7220_s17] sm:$0xff] %v6188_v61 }
 0x79d   : > { %6201 = vrcp.f32 %v4478_v15  ;;  %v6192_v17 = vpop.eup %6191  ;;  %4498 = vst [vmem:[%s7220_s17 + $0x10] sm:$0xff] %v6190_v16  ;;  %v4382_v35 = vadd.f32 %v5325_v29, %v3214_v37 }
 0x79e   : > { %v6194_v36 = vpop.eup %6193  ;;  %4497 = vst [vmem:[%s7220_s17 + $0x8] sm:$0xff] %v6192_v17 }
 0x79f   : > { %v6196_v21 = vpop.eup %6195  ;;  %4499 = vst [vmem:[%s7220_s17 + $0x18] sm:$0xff] %v6194_v36 }
 0x7a0   : > { %4503 = vst [vmem:[%s7220_s17 + $0x38] sm:$0xff] %v6196_v21 }
 0x7a5   : > { %v6198_v51 = vpop.eup %6197 }
 0x7a6   : > { %v6200_v26 = vpop.eup %6199  ;;  %4505 = vst [vmem:[%s7220_s17 + $0x48] sm:$0xff] %v6198_v51 }
 0x7a7   : > { %v6202_v28 = vpop.eup %6201  ;;  %4504 = vst [vmem:[%s7220_s17 + $0x40] sm:$0xff] %v6200_v26 }
 0x7a8   : > { %4506 = vst [vmem:[%s7220_s17 + $0x50] sm:$0xff] %v6202_v28 }
 0x7b7   : > { %v4419_v32 = vpop.f32.mrb[20].mxu0 }
 0x7b8   : > { %v4420_v33 = vadd.f32 %v4419_v32, %v4379_v31  ;;  %v5433_v34 = vpop.f32.mrb[21].mxu0 }
 0x7b9   : > { %v4422_v38 = vpop.f32.mrb[22].mxu0 }
 0x7ba   : > { %v4432_v39 = vsub.f32 0.0, %v4420_v33  ;;  %v4423_v40 = vadd.f32 %v4422_v38, %v4382_v35  ;;  %v5434_v55 = vpop.f32.mrb[23].mxu0 }
 0x7bc   : > { %v4452_v41 = vmul.f32 1.442695, %v4432_v39  ;;  %v4439_v42 = vsub.f32 0.0, %v4423_v40 }
 0x7be   : > { %6203 = vpow2.f32 %v4452_v41  ;;  %v4466_v20 = vmul.f32 1.442695, %v4439_v42 }
 0x7c0   : > { %6205 = vpow2.f32 %v4466_v20 }
 0x7c8   : > { %v6204_v43 = vpop.eup %6203 }
 0x7c9   : > { %v4474_v44 = vadd.f32 1.0, %v6204_v43 }
 0x7ca   : > { %v6206_v56 = vpop.eup %6205 }
 0x7cb   : > { %6207 = vrcp.f32 %v4474_v44  ;;  %v4481_v45 = vadd.f32 1.0, %v6206_v56 }
 0x7cd   : > { %6209 = vrcp.f32 %v4481_v45 }
 0x7d5   : > { %v6208_v50 = vpop.eup %6207 }
 0x7d6   : > { %4502 = vst [vmem:[%s7220_s17 + $0x30] sm:$0xff] %v6208_v50  ;;  %v4335_v52 = vpop.f32.mrb[36].mxu1 }
 0x7d7   : > { %v6210_v53 = vpop.eup %6209  ;;  %v5447_v54 = vadd.f32 %v4335_v52, %v3206_v48  ;;  %v4337_v57 = vpop.f32.mrb[37].mxu1 }
 0x7d8   : > { %4509 = vst [vmem:[%s7220_s17 + $0x68] sm:$0xff] %v6210_v53  ;;  %v5448_v59 = vadd.f32 %v4337_v57, %v3210_v49  ;;  %v4339_v58 = vpop.f32.mrb[38].mxu1 }
 0x7d9   : > { %v4430_v60 = vsub.f32 0.0, %v5447_v54  ;;  %v5449_v62 = vadd.f32 %v4339_v58, %v3206_v48  ;;  %v4341_v63 = vpop.f32.mrb[39].mxu1 }
 0x7da   : > { %v4431_v0 = vsub.f32 0.0, %v5448_v59  ;;  %v5450_v1 = vadd.f32 %v4341_v63, %v3210_v49 }
 0x7db   : > { %v4448_v2 = vmul.f32 1.442695, %v4430_v60  ;;  %v4437_v19 = vsub.f32 0.0, %v5449_v62 }
 0x7dc   : > { %v4450_v3 = vmul.f32 1.442695, %v4431_v0  ;;  %v4438_v4 = vsub.f32 0.0, %v5450_v1 }
 0x7dd   : > { %6211 = vpow2.f32 %v4448_v2  ;;  %v4462_v24 = vmul.f32 1.442695, %v4437_v19 }
 0x7de   : > { %6213 = vpow2.f32 %v4450_v3  ;;  %v4464_v5 = vmul.f32 1.442695, %v4438_v4 }
 0x7df   : > { %6215 = vpow2.f32 %v4462_v24 }
 0x7e0   : > { %6217 = vpow2.f32 %v4464_v5 }
 0x7e7   : > { %v6212_v6 = vpop.eup %6211 }
 0x7e8   : > { %v6214_v7 = vpop.eup %6213  ;;  %v4472_v8 = vadd.f32 1.0, %v6212_v6 }
 0x7e9   : > { %v6216_v9 = vpop.eup %6215  ;;  %v4473_v10 = vadd.f32 1.0, %v6214_v7 }
 0x7ea   : > { %v6218_v11 = vpop.eup %6217  ;;  %6219 = vrcp.f32 %v4472_v8  ;;  %v4479_v12 = vadd.f32 1.0, %v6216_v9 }
 0x7eb   : > { %6221 = vrcp.f32 %v4473_v10  ;;  %v4480_v13 = vadd.f32 1.0, %v6218_v11 }
 0x7ec   : > { %6223 = vrcp.f32 %v4479_v12 }
 0x7ed   : > { %6225 = vrcp.f32 %v4480_v13 }
 0x7f4   : > { %v6220_v14 = vpop.eup %6219 }
 0x7f5   : > { %v6222_v15 = vpop.eup %6221  ;;  %4500 = vst [vmem:[%s7220_s17 + $0x20] sm:$0xff] %v6220_v14 }
 0x7f6   : > { %v6224_v61 = vpop.eup %6223  ;;  %4501 = vst [vmem:[%s7220_s17 + $0x28] sm:$0xff] %v6222_v15 }
 0x7f7   : > { %v6226_v16 = vpop.eup %6225  ;;  %4507 = vst [vmem:[%s7220_s17 + $0x58] sm:$0xff] %v6224_v61 }
 0x7f8   : > { %4508 = vst [vmem:[%s7220_s17 + $0x60] sm:$0xff] %v6226_v16 }
 0x7f9   : > { %6496 = shalt.err (!%p6493_p3)
}
 0x7fa   : > { %s6497_s7 = scalar_lea.hbm %s7244_s29, 1792  ;;  %s6501_s22 = scalar_lea.hbm %s7366_s10, 3584 }
 0x7fb   : > { %p6498_p12 = scmp.ne.s32.totalorder %s7244_s29, %s6497_s7  ;;  %p6502_p7 = scmp.lt.u32.totalorder %s7244_s29, %s7366_s10 }
 0x7fc   : > { %p6503_p6 = scmp.lt.u32.totalorder %s6501_s22, %s6497_s7  ;;  %p6505_p5 = scmp.lt.u32.totalorder %s6497_s7, %s7244_s29 }
 0x7fd   : > { %p6499_p0 = pnand %p6498_p12, %p7365_p9 }
 0x7fe   : > { %p6504_p2 = por %p6503_p6, %p6502_p7 }
 0x7ff   : > { %p6500_p13 = pneg %p6499_p0 }
 0x800   : > { %p6506_p8 = por %p6505_p5, %p6504_p2 }
 0x802   : > { %p6507_p4 = pnand %p6506_p8, %p6500_p13 }
 0x804   : > { %6510 = shalt.err (!%p6507_p4)
}
 0x805   : > { %s6600_s17 = smov 896   ;;  %s6601_s4 = smov 56  }
 0x806   : > { %5509 = dma.vmem_to_hbm [thread:$0]  (%p7365_p9), %s7247_s0, 1792, %s7244_s29, %s4517_s24, %s6600_s17, %s6600_s17, %s6601_s4  }
 0x807 PF: > { %s4568_s26 = sand.u32 1, %s6561_s18   ;;  %p7367_p1 = scmp.ne.s32.totalorder %s7344_s16, 0 }
 0x808   : > { %p7368_p10 = scmp.ge.s32.totalorder %s6573_s21, 2  ;;  %s4569_s9 = scalar_lea.sflag [#allocation4], %s4568_s26 }
 0x80a   : > { %p5540_p11 = pnand %p7368_p10, %p7367_p1 }
 0x80c   : > { %6552 = dma.done.wait (!%p5540_p11), %s4569_s9, 1792  }
 0x80d   : > { %6554 = vsyncadd (!%p5540_p11), %s4569_s9, 4294965504  ;;  %s4578_s5 = scalar_lea.sflag [#allocation18], %s4568_s26 }
 0x80e   : > { %6556 = dma.done.wait (!%p5540_p11), %s4578_s5, 768  }
 0x80f   : > { %6558 = vsyncadd (!%p5540_p11), %s4578_s5, 4294966528  ;;  %p38_p9 = scmp.ge.s32.totalorder %s6870_s14, 4   ;;  %s7369_s18 = smov %s6565_s19 }
 0x810   : > { %s7370_s19 = smov %s6569_s20  ;;  %s7371_s20 = smov %s6881_s30 }
 0x811   : > { %s7372_s21 = smov %s6870_s14  ;;  %40 = sbr.rel (!%p38_p9) target bundleno = 26 (0x1a), region = 175 }
 0x818   :  { %4583 = vsyncpa [#allocation3], 1 }
 0x819   :  { %4585 = vsyncpa [#allocation3 + $0x1], 1 }
 0x81a   :  { %4586 = vsyncpa [#allocation6], 1 }
 0x81b   :  { %4588 = vsyncpa [#allocation6 + $0x1], 1 }
 0x81c   :  { %4589 = vsyncpa [#allocation9], 1 }
 0x81d   :  { %4590 = vsyncpa [#allocation12], 1 }
 0x81e   :  { %4591 = vsyncpa [#allocation15], 1 }
 0x81f   :  { %4592 = vsyncpa [#allocation4], 1 }
 0x820   :  { %4594 = vsyncpa [#allocation4 + $0x1], 1 }
 0x821   :  { %4595 = vsyncpa [#allocation18], 1 }
 0x822   :  { %4597 = vsyncpa [#allocation18 + $0x1], 1 }

</bundles_post_ra>
